<compile_context>
chip_gen: v5e
topology: v5e:2x2
jax: 0.10.0
libtpu: 0.0.40
codegen_flags: <defaults>
</compile_context>

<pallas_src>
import math
import functools

import jax
import jax.numpy as jnp
from jax.experimental import pallas as pl
from jax.experimental.pallas import tpu as pltpu

_VMEM_LIMIT = 32 * 1024 * 1024  # safe on v5e/v6e/v7x


# ----------------------------------------------------------------------------
# tile-size helpers (fall back to full dims at small / odd sizes so the
# (8,128) BlockSpec rule is always satisfied)
# ----------------------------------------------------------------------------

def _row_tile(m):
    """Tile for a second-to-last (sublane) dim of extent m."""
    for c in (512, 256, 128):
        if m % c == 0:
            return c
    if m % 16 == 0:          # small m: split in two (both TCs), keep 8-aligned
        return m // 2
    return m


def _lane_tile(n):
    """Tile for a last (lane) dim of extent n."""
    for c in (512, 256, 128):
        if n % c == 0:
            return c
    return n


# ----------------------------------------------------------------------------
# Pallas kernels
# ----------------------------------------------------------------------------

def _embed_pos_kernel(e_ref, p_ref, o_ref, *, scale):
    # token_emb * sqrt(E) + pos_emb  (pos broadcasts over the batch axis)
    o_ref[0] = e_ref[0] * scale + p_ref[...]


def embed_pos(token_emb, pos_emb, scale):
    """token_emb: (N, L, E) f32, pos_emb: (L, E) f32."""
    N, L, E = token_emb.shape
    return pl.pallas_call(
        functools.partial(_embed_pos_kernel, scale=scale),
        grid=(N,),
        in_specs=[
            pl.BlockSpec((1, L, E), lambda i: (i, 0, 0)),
            pl.BlockSpec((L, E), lambda i: (0, 0)),
        ],
        out_specs=pl.BlockSpec((1, L, E), lambda i: (i, 0, 0)),
        out_shape=jax.ShapeDtypeStruct((N, L, E), jnp.float32),
        compiler_params=pltpu.CompilerParams(
            dimension_semantics=("parallel",)),
    )(token_emb, pos_emb)


def _mha_add_ln_kernel(x_ref, kv_ref, bias_ref, wq_ref, wkv_ref, bq_ref,
                       bkv_ref, wo_ref, bo_ref, g_ref, b_ref, o_ref, *,
                       nhead, head_dim, scale, eps):
    """Fused per-batch-element MHA + residual + LayerNorm.

    x_ref:   (1, L, E) query / residual input          (f32)
    kv_ref:  (1, S, E) key/value source                (f32)
    bias_ref:(1, L, S) additive attention bias          (f32)
    wq_ref:  (E, E)    Q projection  (pre-transposed)   (bf16)
    wkv_ref: (E, 2E)   fused K|V projection             (bf16)
    wo_ref:  (nhead, head_dim, E) output projection     (bf16)
    """
    x = x_ref[0]                       # (L, E) f32
    kv_in = kv_ref[0]                  # (S, E) f32
    bias = bias_ref[0]                 # (L, S) f32
    E = nhead * head_dim

    # fused projections (wide MXU matmuls, bf16 inputs / f32 accumulation)
    q = jnp.dot(x.astype(jnp.bfloat16), wq_ref[...],
                preferred_element_type=jnp.float32) + bq_ref[...]
    kv = jnp.dot(kv_in.astype(jnp.bfloat16), wkv_ref[...],
                 preferred_element_type=jnp.float32) + bkv_ref[...]
    k = kv[:, :E]
    v = kv[:, E:]

    qb = q.astype(jnp.bfloat16)
    kb = k.astype(jnp.bfloat16)
    vb = v.astype(jnp.bfloat16)

    # per-head attention + output projection, accumulated in f32
    acc = jnp.zeros_like(q)            # (L, E) f32
    for h in range(nhead):
        sl = slice(h * head_dim, (h + 1) * head_dim)
        qh = qb[:, sl]                 # (L, d)
        kh = kb[:, sl]                 # (S, d)
        vh = vb[:, sl]                 # (S, d)
        s = jax.lax.dot_general(qh, kh, (((1,), (1,)), ((), ())),
                                preferred_element_type=jnp.float32)
        s = s * scale + bias
        s = s - jnp.max(s, axis=-1, keepdims=True)
        p = jnp.exp(s)
        p = p * pl.reciprocal(jnp.sum(p, axis=-1, keepdims=True), approx=True)
        oh = jnp.dot(p.astype(jnp.bfloat16), vh,
                     preferred_element_type=jnp.float32)       # (L, d)
        acc = acc + jnp.dot(oh.astype(jnp.bfloat16), wo_ref[h],
                            preferred_element_type=jnp.float32)  # (L, E)
    attn_out = acc + bo_ref[...]

    # residual + LayerNorm (f32)
    z = x + attn_out
    mu = jnp.mean(z, axis=-1, keepdims=True)
    var = jnp.mean(jnp.square(z - mu), axis=-1, keepdims=True)
    o_ref[0] = (z - mu) * jax.lax.rsqrt(var + eps) * g_ref[...] + b_ref[...]


def mha_add_ln(x, kv, p, nhead, bias, gamma, beta):
    """x: (N, L, E) query/residual, kv: (N, S, E), bias: (N, L, S)."""
    N, L, E = x.shape
    S = kv.shape[1]
    d = E // nhead
    kernel = functools.partial(_mha_add_ln_kernel, nhead=nhead, head_dim=d,
                               scale=1.0 / math.sqrt(d), eps=1e-5)
    return pl.pallas_call(
        kernel,
        grid=(N,),
        in_specs=[
            pl.BlockSpec((1, L, E), lambda i: (i, 0, 0)),      # x
            pl.BlockSpec((1, S, E), lambda i: (i, 0, 0)),      # kv
            pl.BlockSpec((1, L, S), lambda i: (i, 0, 0)),      # bias (no head replication)
            pl.BlockSpec((E, E), lambda i: (0, 0)),            # wq_t
            pl.BlockSpec((E, 2 * E), lambda i: (0, 0)),        # wkv_t
            pl.BlockSpec((1, E), lambda i: (0, 0)),            # bq
            pl.BlockSpec((1, 2 * E), lambda i: (0, 0)),        # bkv
            pl.BlockSpec((nhead, d, E), lambda i: (0, 0, 0)),  # wo_t (per-head)
            pl.BlockSpec((1, E), lambda i: (0, 0)),            # bo
            pl.BlockSpec((1, E), lambda i: (0, 0)),            # gamma
            pl.BlockSpec((1, E), lambda i: (0, 0)),            # beta
        ],
        out_specs=pl.BlockSpec((1, L, E), lambda i: (i, 0, 0)),
        out_shape=jax.ShapeDtypeStruct((N, L, E), jnp.float32),
        compiler_params=pltpu.CompilerParams(
            dimension_semantics=("parallel",),
            vmem_limit_bytes=_VMEM_LIMIT),
    )(x, kv, bias,
      p["wq_t"], p["wkv_t"], p["bq"].reshape(1, E), p["bkv"].reshape(1, 2 * E),
      p["wo_t"], p["bo"].reshape(1, E),
      gamma.reshape(1, E), beta.reshape(1, E))


def _ffn_add_ln_kernel(x_ref, w1_ref, b1_ref, w2_ref, b2_ref, g_ref, b_ref,
                       o_ref, *, eps):
    # fused lin1 + ReLU + lin2 + residual + LayerNorm; hidden stays in VMEM
    x = x_ref[...]                                            # (tm, E) f32
    h = jnp.dot(x.astype(jnp.bfloat16), w1_ref[...],
                preferred_element_type=jnp.float32) + b1_ref[...]
    h = jnp.maximum(h, 0.0)
    y = jnp.dot(h.astype(jnp.bfloat16), w2_ref[...],
                preferred_element_type=jnp.float32) + b2_ref[...]
    z = x + y
    mu = jnp.mean(z, axis=-1, keepdims=True)
    var = jnp.mean(jnp.square(z - mu), axis=-1, keepdims=True)
    o_ref[...] = (z - mu) * jax.lax.rsqrt(var + eps) * g_ref[...] + b_ref[...]


def ffn_add_ln(x3, p, gamma, beta):
    N, L, E = x3.shape
    M = N * L
    F = p["w1_t"].shape[1]
    x = x3.reshape(M, E)
    tm = _row_tile(M)
    out = pl.pallas_call(
        functools.partial(_ffn_add_ln_kernel, eps=1e-5),
        grid=(M // tm,),
        in_specs=[
            pl.BlockSpec((tm, E), lambda i: (i, 0)),
            pl.BlockSpec((E, F), lambda i: (0, 0)),
            pl.BlockSpec((1, F), lambda i: (0, 0)),
            pl.BlockSpec((F, E), lambda i: (0, 0)),
            pl.BlockSpec((1, E), lambda i: (0, 0)),
            pl.BlockSpec((1, E), lambda i: (0, 0)),
            pl.BlockSpec((1, E), lambda i: (0, 0)),
        ],
        out_specs=pl.BlockSpec((tm, E), lambda i: (i, 0)),
        out_shape=jax.ShapeDtypeStruct((M, E), jnp.float32),
        compiler_params=pltpu.CompilerParams(
            dimension_semantics=("parallel",),
            vmem_limit_bytes=_VMEM_LIMIT),
    )(x, p["w1_t"], p["b1"].reshape(1, F), p["w2_t"], p["b2"].reshape(1, E),
      gamma.reshape(1, E), beta.reshape(1, E))
    return out.reshape(N, L, E)


def _ln_kernel(x_ref, g_ref, b_ref, o_ref, *, eps):
    x = x_ref[...]
    mu = jnp.mean(x, axis=-1, keepdims=True)
    var = jnp.mean(jnp.square(x - mu), axis=-1, keepdims=True)
    o_ref[...] = (x - mu) * jax.lax.rsqrt(var + eps) * g_ref[...] + b_ref[...]


def layer_norm(x3, gamma, beta, eps=1e-5):
    """Plain LayerNorm on (N, L, E) (final encoder / decoder norms)."""
    N, L, E = x3.shape
    M = N * L
    x = x3.reshape(M, E)
    tm = _row_tile(M)
    out = pl.pallas_call(
        functools.partial(_ln_kernel, eps=eps),
        grid=(M // tm,),
        in_specs=[
            pl.BlockSpec((tm, E), lambda i: (i, 0)),
            pl.BlockSpec((1, E), lambda i: (0, 0)),
            pl.BlockSpec((1, E), lambda i: (0, 0)),
        ],
        out_specs=pl.BlockSpec((tm, E), lambda i: (i, 0)),
        out_shape=jax.ShapeDtypeStruct((M, E), jnp.float32),
        compiler_params=pltpu.CompilerParams(
            dimension_semantics=("parallel",)),
    )(x, gamma.reshape(1, E), beta.reshape(1, E))
    return out.reshape(N, L, E)


def _linear_kernel(x_ref, w_ref, b_ref, o_ref):
    o_ref[...] = jnp.dot(x_ref[...].astype(jnp.bfloat16), w_ref[...],
                         preferred_element_type=jnp.float32) + b_ref[...]


def generator(x2, w_t, b):
    """x2: (M, E) f32, w_t: (E, V) bf16 (pre-transposed), b: (V,) f32."""
    M, E = x2.shape
    V = w_t.shape[1]
    tm = _row_tile(M)
    tn = _lane_tile(V)
    return pl.pallas_call(
        _linear_kernel,
        grid=(M // tm, V // tn),
        in_specs=[
            pl.BlockSpec((tm, E), lambda i, j: (i, 0)),
            pl.BlockSpec((E, tn), lambda i, j: (0, j)),
            pl.BlockSpec((1, tn), lambda i, j: (0, j)),
        ],
        out_specs=pl.BlockSpec((tm, tn), lambda i, j: (i, j)),
        out_shape=jax.ShapeDtypeStruct((M, V), jnp.float32),
        compiler_params=pltpu.CompilerParams(
            dimension_semantics=("parallel", "parallel"),
            vmem_limit_bytes=_VMEM_LIMIT),
    )(x2, w_t, b.reshape(1, V))


# ----------------------------------------------------------------------------
# Transformer blocks (thin glue around the fused kernels)
# ----------------------------------------------------------------------------

def attn_bias(attn_mask, key_padding_mask, N, L, S):
    """Additive bias (N, L, S): float attn_mask + bool key padding mask."""
    # NOTE: fully-masked rows produce a uniform softmax here (bias=-1e9)
    # instead of the NaN PyTorch emits; such rows never occur in the demo.
    bias = jnp.zeros((N, L, S), jnp.float32)
    if attn_mask is not None:
        bias = bias + attn_mask[None, :, :].astype(jnp.float32)
    if key_padding_mask is not None:
        bias = bias + jnp.where(key_padding_mask[:, None, :],
                                jnp.float32(-1e9), jnp.float32(0.0))
    return bias


def encoder_layer(x, p, nhead, bias):
    # TODO(synk): dropout layers are eval-mode identities (no RNG dropout).
    x = mha_add_ln(x, x, p["sa"], nhead, bias, p["ln1_g"], p["ln1_b"])
    x = ffn_add_ln(x, p, p["ln2_g"], p["ln2_b"])
    return x


def decoder_layer(x, memory, p, nhead, tgt_bias, mem_bias):
    x = mha_add_ln(x, x, p["sa"], nhead, tgt_bias, p["ln1_g"], p["ln1_b"])
    x = mha_add_ln(x, memory, p["ca"], nhead, mem_bias, p["ln2_g"], p["ln2_b"])
    x = ffn_add_ln(x, p, p["ln3_g"], p["ln3_b"])
    return x


def seq2seq_forward(params, src, tgt, src_mask, tgt_mask,
                    src_padding_mask, tgt_padding_mask,
                    memory_key_padding_mask, nhead):
    S, N = src.shape
    T = tgt.shape[0]
    E = params["src_emb"].shape[1]
    pos = params["pos_emb"]                      # (max_len, E)

    # TODO(synk): the embedding gather stays an XLA jnp.take (no clean
    # rectangular-BlockSpec Pallas equivalent at these shapes).
    src_tok = jnp.take(params["src_emb"], src.T, axis=0)   # (N, S, E)
    tgt_tok = jnp.take(params["tgt_emb"], tgt.T, axis=0)   # (N, T, E)
    x = embed_pos(src_tok, pos[:S], math.sqrt(E))
    y = embed_pos(tgt_tok, pos[:T], math.sqrt(E))

    src_bias = attn_bias(src_mask, src_padding_mask, N, S, S)
    tgt_bias = attn_bias(tgt_mask, tgt_padding_mask, N, T, T)
    mem_bias = attn_bias(None, memory_key_padding_mask, N, T, S)

    for lp in params["enc_layers"]:
        x = encoder_layer(x, lp, nhead, src_bias)
    memory = layer_norm(x, params["enc_norm_g"], params["enc_norm_b"])

    for lp in params["dec_layers"]:
        y = decoder_layer(y, memory, lp, nhead, tgt_bias, mem_bias)
    y = layer_norm(y, params["dec_norm_g"], params["dec_norm_b"])

    logits = generator(y.reshape(N * T, E), params["gen_w_t"], params["gen_b"])
    # back to PyTorch's (T, N, V) sequence-major output layout
    return logits.reshape(N, T, -1).transpose(1, 0, 2)


# ----------------------------------------------------------------------------
# Deterministic parameter construction (weights pre-transposed, bf16 matmuls)
# ----------------------------------------------------------------------------

def make_pos_emb(emb_size, max_len=5000):
    den = jnp.exp(-jnp.arange(0, emb_size, 2, dtype=jnp.float32)
                  * (math.log(10000.0) / emb_size))
    pos = jnp.arange(max_len, dtype=jnp.float32)[:, None]
    pe = jnp.zeros((max_len, emb_size), jnp.float32)
    pe = pe.at[:, 0::2].set(jnp.sin(pos * den))
    pe = pe.at[:, 1::2].set(jnp.cos(pos * den))
    return pe                                   # (max_len, emb_size)


def init_params(key, num_enc, num_dec, emb_size, src_vocab, tgt_vocab,
                ffdim, nhead):
    keys = iter(jax.random.split(key, 256))

    def nk():
        return next(keys)

    def xavier(shape):
        bound = math.sqrt(6.0 / (shape[0] + shape[1]))
        return jax.random.uniform(nk(), shape, jnp.float32, -bound, bound)

    def bias(n):
        return jax.random.uniform(nk(), (n,), jnp.float32, -0.05, 0.05)

    E = emb_size
    d = E // nhead

    def mha_p():
        in_w = xavier((3 * E, E))               # PyTorch in_proj layout
        in_b = bias(3 * E)
        out_w = xavier((E, E))
        return dict(
            wq_t=jnp.transpose(in_w[:E]).astype(jnp.bfloat16),        # (E, E)
            wkv_t=jnp.transpose(in_w[E:]).astype(jnp.bfloat16),       # (E, 2E)
            bq=in_b[:E], bkv=in_b[E:],
            wo_t=jnp.transpose(out_w).reshape(nhead, d, E).astype(jnp.bfloat16),
            bo=bias(E))

    def ffn_p():
        return dict(
            w1_t=jnp.transpose(xavier((ffdim, E))).astype(jnp.bfloat16),
            b1=bias(ffdim),
            w2_t=jnp.transpose(xavier((E, ffdim))).astype(jnp.bfloat16),
            b2=bias(E))

    def enc_layer_p():
        p = dict(sa=mha_p())
        p.update(ffn_p())
        p.update(ln1_g=jnp.ones((E,), jnp.float32),
                 ln1_b=jnp.zeros((E,), jnp.float32),
                 ln2_g=jnp.ones((E,), jnp.float32),
                 ln2_b=jnp.zeros((E,), jnp.float32))
        return p

    def dec_layer_p():
        p = enc_layer_p()
        p["ca"] = mha_p()
        p["ln3_g"] = jnp.ones((E,), jnp.float32)
        p["ln3_b"] = jnp.zeros((E,), jnp.float32)
        return p

    return dict(
        src_emb=jax.random.normal(nk(), (src_vocab, E), jnp.float32),
        tgt_emb=jax.random.normal(nk(), (tgt_vocab, E), jnp.float32),
        pos_emb=make_pos_emb(E),
        enc_layers=[enc_layer_p() for _ in range(num_enc)],
        dec_layers=[dec_layer_p() for _ in range(num_dec)],
        enc_norm_g=jnp.ones((E,), jnp.float32),
        enc_norm_b=jnp.zeros((E,), jnp.float32),
        dec_norm_g=jnp.ones((E,), jnp.float32),
        dec_norm_b=jnp.zeros((E,), jnp.float32),
        gen_w_t=jnp.transpose(xavier((tgt_vocab, E))).astype(jnp.bfloat16),
        gen_b=bias(tgt_vocab),
    )


# ----------------------------------------------------------------------------
# Demo
# ----------------------------------------------------------------------------

if __name__ == "__main__":
    NUM_ENC, NUM_DEC = 2, 2
    EMB, NHEAD = 32, 4
    SRC_VOCAB, TGT_VOCAB = 50, 60
    FF = 64
    S, T, N = 8, 8, 2

    root = jax.random.PRNGKey(0)
    pkey, skey, tkey = jax.random.split(root, 3)
    params = init_params(pkey, NUM_ENC, NUM_DEC, EMB, SRC_VOCAB, TGT_VOCAB,
                         FF, NHEAD)

    src = jax.random.randint(skey, (S, N), 0, SRC_VOCAB, dtype=jnp.int32)
    tgt = jax.random.randint(tkey, (T, N), 0, TGT_VOCAB, dtype=jnp.int32)

    src_mask = jnp.zeros((S, S), jnp.float32)
    tgt_mask = jnp.where(jnp.triu(jnp.ones((T, T), jnp.bool_), k=1),
                         jnp.float32(-1e9), jnp.float32(0.0))
    src_padding_mask = jnp.arange(S)[None, :] >= jnp.array([S, S - 2])[:, None]
    tgt_padding_mask = jnp.arange(T)[None, :] >= jnp.array([T, T - 1])[:, None]
    memory_key_padding_mask = src_padding_mask

    fwd = jax.jit(functools.partial(seq2seq_forward, nhead=NHEAD))
    out = fwd(params, src, tgt, src_mask, tgt_mask,
              src_padding_mask, tgt_padding_mask, memory_key_padding_mask)
    out = jax.block_until_ready(out)

    assert out.shape == (T, N, TGT_VOCAB), out.shape
    assert out.dtype == jnp.float32
    assert bool(jnp.all(jnp.isfinite(out)))
    print("KERNEL_OK")
</pallas_src>

<mosaic_0001>
module attributes {stable_mosaic.version = 11 : i64} {
  func.func @_embed_pos_kernel(%arg0: i32, %arg1: memref<1x8x32xf32, #tpu.memory_space<vmem>>, %arg2: memref<8x32xf32, #tpu.memory_space<vmem>>, %arg3: memref<1x8x32xf32, #tpu.memory_space<vmem>>) attributes {dimension_semantics = [#tpu.dimension_semantics<parallel>], iteration_bounds = array<i64: 2>, scalar_prefetch = 0 : i64, scratch_operands = 0 : i64, tpu.core_type = #tpu.core_type<tc>, window_params = [{transform_indices = @transform_0, window_bounds = array<i64: 1, 8, 32>}, {pipeline_mode = #tpu.pipeline_mode<synchronous>, transform_indices = @transform_1, window_bounds = array<i64: 8, 32>}, {transform_indices = @transform_2, window_bounds = array<i64: 1, 8, 32>}]} {
    %c0 = arith.constant 0 : index
    %c0_0 = arith.constant 0 : index
    %c0_1 = arith.constant 0 : index
    %0 = vector.load %arg1[%c0, %c0_0, %c0_1] : memref<1x8x32xf32, #tpu.memory_space<vmem>>, vector<1x8x32xf32>
    %1 = vector.shape_cast %0 : vector<1x8x32xf32> to vector<8x32xf32>
    %cst = arith.constant 5.65685415 : f32
    %2 = vector.broadcast %cst : f32 to vector<8x32xf32>
    %3 = arith.mulf %1, %2 : vector<8x32xf32>
    %c0_2 = arith.constant 0 : index
    %c0_3 = arith.constant 0 : index
    %4 = vector.load %arg2[%c0_2, %c0_3] : memref<8x32xf32, #tpu.memory_space<vmem>>, vector<8x32xf32>
    %5 = arith.addf %3, %4 : vector<8x32xf32>
    %c0_4 = arith.constant 0 : index
    %c0_5 = arith.constant 0 : index
    %c0_6 = arith.constant 0 : index
    %6 = vector.load %arg3[%c0_4, %c0_5, %c0_6] : memref<1x8x32xf32, #tpu.memory_space<vmem>>, vector<1x8x32xf32>
    %7 = vector.shape_cast %6 : vector<1x8x32xf32> to vector<8x32xf32>
    %8 = vector.shape_cast %5 : vector<8x32xf32> to vector<1x8x32xf32>
    tpu.vector_store %arg3[%c0_4, %c0_5, %c0_6], %8 {strides = array<i32>} : memref<1x8x32xf32, #tpu.memory_space<vmem>>, vector<1x8x32xf32>,
    return
  }
  func.func @transform_0(%arg0: i32) -> (i32, i32, i32) {
    %c0_i32 = arith.constant 0 : i32
    %c0_i32_0 = arith.constant 0 : i32
    %c0_i32_1 = arith.constant 0 : i32
    return %arg0, %c0_i32, %c0_i32_0 : i32, i32, i32
  }
  func.func @transform_1(%arg0: i32) -> (i32, i32) {
    %c0_i32 = arith.constant 0 : i32
    %c0_i32_0 = arith.constant 0 : i32
    %c0_i32_1 = arith.constant 0 : i32
    return %c0_i32, %c0_i32_0 : i32, i32
  }
  func.func @transform_2(%arg0: i32) -> (i32, i32, i32) {
    %c0_i32 = arith.constant 0 : i32
    %c0_i32_0 = arith.constant 0 : i32
    %c0_i32_1 = arith.constant 0 : i32
    return %arg0, %c0_i32, %c0_i32_0 : i32, i32, i32
  }
}

module attributes {stable_mosaic.version = 11 : i64} {
  func.func @_mha_add_ln_kernel(%arg0: i32, %arg1: memref<1x8x32xf32, #tpu.memory_space<vmem>>, %arg2: memref<1x8x32xf32, #tpu.memory_space<vmem>>, %arg3: memref<1x8x8xf32, #tpu.memory_space<vmem>>, %arg4: memref<32x32xbf16, #tpu.memory_space<vmem>>, %arg5: memref<32x64xbf16, #tpu.memory_space<vmem>>, %arg6: memref<1x32xf32, #tpu.memory_space<vmem>>, %arg7: memref<1x64xf32, #tpu.memory_space<vmem>>, %arg8: memref<4x8x32xbf16, #tpu.memory_space<vmem>>, %arg9: memref<1x32xf32, #tpu.memory_space<vmem>>, %arg10: memref<1x32xf32, #tpu.memory_space<vmem>>, %arg11: memref<1x32xf32, #tpu.memory_space<vmem>>, %arg12: memref<1x8x32xf32, #tpu.memory_space<vmem>>) attributes {dimension_semantics = [#tpu.dimension_semantics<parallel>], iteration_bounds = array<i64: 2>, scalar_prefetch = 0 : i64, scratch_operands = 0 : i64, tpu.core_type = #tpu.core_type<tc>, window_params = [{transform_indices = @transform_0, window_bounds = array<i64: 1, 8, 32>}, {transform_indices = @transform_1, window_bounds = array<i64: 1, 8, 32>}, {transform_indices = @transform_2, window_bounds = array<i64: 1, 8, 8>}, {pipeline_mode = #tpu.pipeline_mode<synchronous>, transform_indices = @transform_3, window_bounds = array<i64: 32, 32>}, {pipeline_mode = #tpu.pipeline_mode<synchronous>, transform_indices = @transform_4, window_bounds = array<i64: 32, 64>}, {pipeline_mode = #tpu.pipeline_mode<synchronous>, transform_indices = @transform_5, window_bounds = array<i64: 1, 32>}, {pipeline_mode = #tpu.pipeline_mode<synchronous>, transform_indices = @transform_6, window_bounds = array<i64: 1, 64>}, {pipeline_mode = #tpu.pipeline_mode<synchronous>, transform_indices = @transform_7, window_bounds = array<i64: 4, 8, 32>}, {pipeline_mode = #tpu.pipeline_mode<synchronous>, transform_indices = @transform_8, window_bounds = array<i64: 1, 32>}, {pipeline_mode = #tpu.pipeline_mode<synchronous>, transform_indices = @transform_9, window_bounds = array<i64: 1, 32>}, {pipeline_mode = #tpu.pipeline_mode<synchronous>, transform_indices = @transform_10, window_bounds = array<i64: 1, 32>}, {transform_indices = @transform_11, window_bounds = array<i64: 1, 8, 32>}]} {
    %c0 = arith.constant 0 : index
    %c0_0 = arith.constant 0 : index
    %c0_1 = arith.constant 0 : index
    %0 = vector.load %arg1[%c0, %c0_0, %c0_1] : memref<1x8x32xf32, #tpu.memory_space<vmem>>, vector<1x8x32xf32>
    %1 = vector.shape_cast %0 : vector<1x8x32xf32> to vector<8x32xf32>
    %c0_2 = arith.constant 0 : index
    %c0_3 = arith.constant 0 : index
    %c0_4 = arith.constant 0 : index
    %2 = vector.load %arg2[%c0_2, %c0_3, %c0_4] : memref<1x8x32xf32, #tpu.memory_space<vmem>>, vector<1x8x32xf32>
    %3 = vector.shape_cast %2 : vector<1x8x32xf32> to vector<8x32xf32>
    %c0_5 = arith.constant 0 : index
    %c0_6 = arith.constant 0 : index
    %c0_7 = arith.constant 0 : index
    %4 = vector.load %arg3[%c0_5, %c0_6, %c0_7] : memref<1x8x8xf32, #tpu.memory_space<vmem>>, vector<1x8x8xf32>
    %5 = vector.shape_cast %4 : vector<1x8x8xf32> to vector<8x8xf32>
    %6 = arith.truncf %1 : vector<8x32xf32> to vector<8x32xbf16>
    %c0_8 = arith.constant 0 : index
    %c0_9 = arith.constant 0 : index
    %7 = vector.load %arg4[%c0_8, %c0_9] : memref<32x32xbf16, #tpu.memory_space<vmem>>, vector<32x32xbf16>
    %cst = arith.constant dense<0.000000e+00> : vector<8x32xf32>
    %8 = tpu.matmul %6, %7, %cst {dimension_numbers = #tpu.dot_dimension_numbers<[1], [0], [0], [1], [0, 0, 1, 1], [], []>} : vector<8x32xbf16>, vector<32x32xbf16>, vector<8x32xf32> -> vector<8x32xf32>
    %c0_10 = arith.constant 0 : index
    %c0_11 = arith.constant 0 : index
    %9 = vector.load %arg6[%c0_10, %c0_11] : memref<1x32xf32, #tpu.memory_space<vmem>>, vector<1x32xf32>
    %10 = vector.broadcast %9 : vector<1x32xf32> to vector<8x32xf32>
    %11 = arith.addf %8, %10 : vector<8x32xf32>
    %12 = arith.truncf %3 : vector<8x32xf32> to vector<8x32xbf16>
    %c0_12 = arith.constant 0 : index
    %c0_13 = arith.constant 0 : index
    %13 = vector.load %arg5[%c0_12, %c0_13] : memref<32x64xbf16, #tpu.memory_space<vmem>>, vector<32x64xbf16>
    %cst_14 = arith.constant dense<0.000000e+00> : vector<8x64xf32>
    %14 = tpu.matmul %12, %13, %cst_14 {dimension_numbers = #tpu.dot_dimension_numbers<[1], [0], [0], [1], [0, 0, 1, 1], [], []>} : vector<8x32xbf16>, vector<32x64xbf16>, vector<8x64xf32> -> vector<8x64xf32>
    %c0_15 = arith.constant 0 : index
    %c0_16 = arith.constant 0 : index
    %15 = vector.load %arg7[%c0_15, %c0_16] : memref<1x64xf32, #tpu.memory_space<vmem>>, vector<1x64xf32>
    %16 = vector.broadcast %15 : vector<1x64xf32> to vector<8x64xf32>
    %17 = arith.addf %14, %16 : vector<8x64xf32>
    %18 = vector.extract_strided_slice %17 {offsets = [0, 0], sizes = [8, 32], strides = [1, 1]} : vector<8x64xf32> to vector<8x32xf32>
    %19 = vector.extract_strided_slice %17 {offsets = [0, 32], sizes = [8, 32], strides = [1, 1]} : vector<8x64xf32> to vector<8x32xf32>
    %20 = arith.truncf %11 : vector<8x32xf32> to vector<8x32xbf16>
    %21 = arith.truncf %18 : vector<8x32xf32> to vector<8x32xbf16>
    %22 = arith.truncf %19 : vector<8x32xf32> to vector<8x32xbf16>
    %cst_17 = arith.constant 0.000000e+00 : f32
    %23 = vector.broadcast %cst_17 : f32 to vector<8x32xf32>
    %24 = vector.extract_strided_slice %20 {offsets = [0, 0], sizes = [8, 8], strides = [1, 1]} : vector<8x32xbf16> to vector<8x8xbf16>
    %25 = vector.extract_strided_slice %21 {offsets = [0, 0], sizes = [8, 8], strides = [1, 1]} : vector<8x32xbf16> to vector<8x8xbf16>
    %26 = vector.extract_strided_slice %22 {offsets = [0, 0], sizes = [8, 8], strides = [1, 1]} : vector<8x32xbf16> to vector<8x8xbf16>
    %cst_18 = arith.constant dense<0.000000e+00> : vector<8x8xf32>
    %27 = tpu.matmul %24, %25, %cst_18 {dimension_numbers = #tpu.dot_dimension_numbers<[1], [1], [0], [0], [0, 0, 1, 0], [], []>} : vector<8x8xbf16>, vector<8x8xbf16>, vector<8x8xf32> -> vector<8x8xf32>
    %cst_19 = arith.constant 0.353553385 : f32
    %28 = vector.broadcast %cst_19 : f32 to vector<8x8xf32>
    %29 = arith.mulf %27, %28 : vector<8x8xf32>
    %30 = arith.addf %29, %5 : vector<8x8xf32>
    %cst_20 = arith.constant dense<0xFF800000> : vector<8xf32>
    %31 = vector.multi_reduction <maximumf>, %30, %cst_20 [1] : vector<8x8xf32> to vector<8xf32>
    %32 = vector.shape_cast %31 : vector<8xf32> to vector<8x1xf32>
    %33 = vector.broadcast %32 : vector<8x1xf32> to vector<8x8xf32>
    %34 = arith.subf %30, %33 : vector<8x8xf32>
    %35 = math.exp %34 : vector<8x8xf32>
    %cst_21 = arith.constant dense<0.000000e+00> : vector<8xf32>
    %36 = vector.multi_reduction <add>, %35, %cst_21 [1] : vector<8x8xf32> to vector<8xf32>
    %37 = vector.shape_cast %36 : vector<8xf32> to vector<8x1xf32>
    %38 = tpu.reciprocal %37 {approx = true} : vector<8x1xf32> -> vector<8x1xf32>
    %39 = vector.broadcast %38 : vector<8x1xf32> to vector<8x8xf32>
    %40 = arith.mulf %35, %39 : vector<8x8xf32>
    %41 = arith.truncf %40 : vector<8x8xf32> to vector<8x8xbf16>
    %cst_22 = arith.constant dense<0.000000e+00> : vector<8x8xf32>
    %42 = tpu.matmul %41, %26, %cst_22 {dimension_numbers = #tpu.dot_dimension_numbers<[1], [0], [0], [1], [0, 0, 1, 1], [], []>} : vector<8x8xbf16>, vector<8x8xbf16>, vector<8x8xf32> -> vector<8x8xf32>
    %43 = arith.truncf %42 : vector<8x8xf32> to vector<8x8xbf16>
    %c0_23 = arith.constant 0 : index
    %c0_24 = arith.constant 0 : index
    %c0_25 = arith.constant 0 : index
    %44 = vector.load %arg8[%c0_23, %c0_24, %c0_25] : memref<4x8x32xbf16, #tpu.memory_space<vmem>>, vector<1x8x32xbf16>
    %45 = vector.shape_cast %44 : vector<1x8x32xbf16> to vector<8x32xbf16>
    %cst_26 = arith.constant dense<0.000000e+00> : vector<8x32xf32>
    %46 = tpu.matmul %43, %45, %cst_26 {dimension_numbers = #tpu.dot_dimension_numbers<[1], [0], [0], [1], [0, 0, 1, 1], [], []>} : vector<8x8xbf16>, vector<8x32xbf16>, vector<8x32xf32> -> vector<8x32xf32>
    %47 = arith.addf %23, %46 : vector<8x32xf32>
    %48 = vector.extract_strided_slice %20 {offsets = [0, 8], sizes = [8, 8], strides = [1, 1]} : vector<8x32xbf16> to vector<8x8xbf16>
    %49 = vector.extract_strided_slice %21 {offsets = [0, 8], sizes = [8, 8], strides = [1, 1]} : vector<8x32xbf16> to vector<8x8xbf16>
    %50 = vector.extract_strided_slice %22 {offsets = [0, 8], sizes = [8, 8], strides = [1, 1]} : vector<8x32xbf16> to vector<8x8xbf16>
    %cst_27 = arith.constant dense<0.000000e+00> : vector<8x8xf32>
    %51 = tpu.matmul %48, %49, %cst_27 {dimension_numbers = #tpu.dot_dimension_numbers<[1], [1], [0], [0], [0, 0, 1, 0], [], []>} : vector<8x8xbf16>, vector<8x8xbf16>, vector<8x8xf32> -> vector<8x8xf32>
    %cst_28 = arith.constant 0.353553385 : f32
    %52 = vector.broadcast %cst_28 : f32 to vector<8x8xf32>
    %53 = arith.mulf %51, %52 : vector<8x8xf32>
    %54 = arith.addf %53, %5 : vector<8x8xf32>
    %cst_29 = arith.constant dense<0xFF800000> : vector<8xf32>
    %55 = vector.multi_reduction <maximumf>, %54, %cst_29 [1] : vector<8x8xf32> to vector<8xf32>
    %56 = vector.shape_cast %55 : vector<8xf32> to vector<8x1xf32>
    %57 = vector.broadcast %56 : vector<8x1xf32> to vector<8x8xf32>
    %58 = arith.subf %54, %57 : vector<8x8xf32>
    %59 = math.exp %58 : vector<8x8xf32>
    %cst_30 = arith.constant dense<0.000000e+00> : vector<8xf32>
    %60 = vector.multi_reduction <add>, %59, %cst_30 [1] : vector<8x8xf32> to vector<8xf32>
    %61 = vector.shape_cast %60 : vector<8xf32> to vector<8x1xf32>
    %62 = tpu.reciprocal %61 {approx = true} : vector<8x1xf32> -> vector<8x1xf32>
    %63 = vector.broadcast %62 : vector<8x1xf32> to vector<8x8xf32>
    %64 = arith.mulf %59, %63 : vector<8x8xf32>
    %65 = arith.truncf %64 : vector<8x8xf32> to vector<8x8xbf16>
    %cst_31 = arith.constant dense<0.000000e+00> : vector<8x8xf32>
    %66 = tpu.matmul %65, %50, %cst_31 {dimension_numbers = #tpu.dot_dimension_numbers<[1], [0], [0], [1], [0, 0, 1, 1], [], []>} : vector<8x8xbf16>, vector<8x8xbf16>, vector<8x8xf32> -> vector<8x8xf32>
    %67 = arith.truncf %66 : vector<8x8xf32> to vector<8x8xbf16>
    %c1 = arith.constant 1 : index
    %c0_32 = arith.constant 0 : index
    %c0_33 = arith.constant 0 : index
    %68 = vector.load %arg8[%c1, %c0_32, %c0_33] : memref<4x8x32xbf16, #tpu.memory_space<vmem>>, vector<1x8x32xbf16>
    %69 = vector.shape_cast %68 : vector<1x8x32xbf16> to vector<8x32xbf16>
    %cst_34 = arith.constant dense<0.000000e+00> : vector<8x32xf32>
    %70 = tpu.matmul %67, %69, %cst_34 {dimension_numbers = #tpu.dot_dimension_numbers<[1], [0], [0], [1], [0, 0, 1, 1], [], []>} : vector<8x8xbf16>, vector<8x32xbf16>, vector<8x32xf32> -> vector<8x32xf32>
    %71 = arith.addf %47, %70 : vector<8x32xf32>
    %72 = vector.extract_strided_slice %20 {offsets = [0, 16], sizes = [8, 8], strides = [1, 1]} : vector<8x32xbf16> to vector<8x8xbf16>
    %73 = vector.extract_strided_slice %21 {offsets = [0, 16], sizes = [8, 8], strides = [1, 1]} : vector<8x32xbf16> to vector<8x8xbf16>
    %74 = vector.extract_strided_slice %22 {offsets = [0, 16], sizes = [8, 8], strides = [1, 1]} : vector<8x32xbf16> to vector<8x8xbf16>
    %cst_35 = arith.constant dense<0.000000e+00> : vector<8x8xf32>
    %75 = tpu.matmul %72, %73, %cst_35 {dimension_numbers = #tpu.dot_dimension_numbers<[1], [1], [0], [0], [0, 0, 1, 0], [], []>} : vector<8x8xbf16>, vector<8x8xbf16>, vector<8x8xf32> -> vector<8x8xf32>
    %cst_36 = arith.constant 0.353553385 : f32
    %76 = vector.broadcast %cst_36 : f32 to vector<8x8xf32>
    %77 = arith.mulf %75, %76 : vector<8x8xf32>
    %78 = arith.addf %77, %5 : vector<8x8xf32>
    %cst_37 = arith.constant dense<0xFF800000> : vector<8xf32>
    %79 = vector.multi_reduction <maximumf>, %78, %cst_37 [1] : vector<8x8xf32> to vector<8xf32>
    %80 = vector.shape_cast %79 : vector<8xf32> to vector<8x1xf32>
    %81 = vector.broadcast %80 : vector<8x1xf32> to vector<8x8xf32>
    %82 = arith.subf %78, %81 : vector<8x8xf32>
    %83 = math.exp %82 : vector<8x8xf32>
    %cst_38 = arith.constant dense<0.000000e+00> : vector<8xf32>
    %84 = vector.multi_reduction <add>, %83, %cst_38 [1] : vector<8x8xf32> to vector<8xf32>
    %85 = vector.shape_cast %84 : vector<8xf32> to vector<8x1xf32>
    %86 = tpu.reciprocal %85 {approx = true} : vector<8x1xf32> -> vector<8x1xf32>
    %87 = vector.broadcast %86 : vector<8x1xf32> to vector<8x8xf32>
    %88 = arith.mulf %83, %87 : vector<8x8xf32>
    %89 = arith.truncf %88 : vector<8x8xf32> to vector<8x8xbf16>
    %cst_39 = arith.constant dense<0.000000e+00> : vector<8x8xf32>
    %90 = tpu.matmul %89, %74, %cst_39 {dimension_numbers = #tpu.dot_dimension_numbers<[1], [0], [0], [1], [0, 0, 1, 1], [], []>} : vector<8x8xbf16>, vector<8x8xbf16>, vector<8x8xf32> -> vector<8x8xf32>
    %91 = arith.truncf %90 : vector<8x8xf32> to vector<8x8xbf16>
    %c2 = arith.constant 2 : index
    %c0_40 = arith.constant 0 : index
    %c0_41 = arith.constant 0 : index
    %92 = vector.load %arg8[%c2, %c0_40, %c0_41] : memref<4x8x32xbf16, #tpu.memory_space<vmem>>, vector<1x8x32xbf16>
    %93 = vector.shape_cast %92 : vector<1x8x32xbf16> to vector<8x32xbf16>
    %cst_42 = arith.constant dense<0.000000e+00> : vector<8x32xf32>
    %94 = tpu.matmul %91, %93, %cst_42 {dimension_numbers = #tpu.dot_dimension_numbers<[1], [0], [0], [1], [0, 0, 1, 1], [], []>} : vector<8x8xbf16>, vector<8x32xbf16>, vector<8x32xf32> -> vector<8x32xf32>
    %95 = arith.addf %71, %94 : vector<8x32xf32>
    %96 = vector.extract_strided_slice %20 {offsets = [0, 24], sizes = [8, 8], strides = [1, 1]} : vector<8x32xbf16> to vector<8x8xbf16>
    %97 = vector.extract_strided_slice %21 {offsets = [0, 24], sizes = [8, 8], strides = [1, 1]} : vector<8x32xbf16> to vector<8x8xbf16>
    %98 = vector.extract_strided_slice %22 {offsets = [0, 24], sizes = [8, 8], strides = [1, 1]} : vector<8x32xbf16> to vector<8x8xbf16>
    %cst_43 = arith.constant dense<0.000000e+00> : vector<8x8xf32>
    %99 = tpu.matmul %96, %97, %cst_43 {dimension_numbers = #tpu.dot_dimension_numbers<[1], [1], [0], [0], [0, 0, 1, 0], [], []>} : vector<8x8xbf16>, vector<8x8xbf16>, vector<8x8xf32> -> vector<8x8xf32>
    %cst_44 = arith.constant 0.353553385 : f32
    %100 = vector.broadcast %cst_44 : f32 to vector<8x8xf32>
    %101 = arith.mulf %99, %100 : vector<8x8xf32>
    %102 = arith.addf %101, %5 : vector<8x8xf32>
    %cst_45 = arith.constant dense<0xFF800000> : vector<8xf32>
    %103 = vector.multi_reduction <maximumf>, %102, %cst_45 [1] : vector<8x8xf32> to vector<8xf32>
    %104 = vector.shape_cast %103 : vector<8xf32> to vector<8x1xf32>
    %105 = vector.broadcast %104 : vector<8x1xf32> to vector<8x8xf32>
    %106 = arith.subf %102, %105 : vector<8x8xf32>
    %107 = math.exp %106 : vector<8x8xf32>
    %cst_46 = arith.constant dense<0.000000e+00> : vector<8xf32>
    %108 = vector.multi_reduction <add>, %107, %cst_46 [1] : vector<8x8xf32> to vector<8xf32>
    %109 = vector.shape_cast %108 : vector<8xf32> to vector<8x1xf32>
    %110 = tpu.reciprocal %109 {approx = true} : vector<8x1xf32> -> vector<8x1xf32>
    %111 = vector.broadcast %110 : vector<8x1xf32> to vector<8x8xf32>
    %112 = arith.mulf %107, %111 : vector<8x8xf32>
    %113 = arith.truncf %112 : vector<8x8xf32> to vector<8x8xbf16>
    %cst_47 = arith.constant dense<0.000000e+00> : vector<8x8xf32>
    %114 = tpu.matmul %113, %98, %cst_47 {dimension_numbers = #tpu.dot_dimension_numbers<[1], [0], [0], [1], [0, 0, 1, 1], [], []>} : vector<8x8xbf16>, vector<8x8xbf16>, vector<8x8xf32> -> vector<8x8xf32>
    %115 = arith.truncf %114 : vector<8x8xf32> to vector<8x8xbf16>
    %c3 = arith.constant 3 : index
    %c0_48 = arith.constant 0 : index
    %c0_49 = arith.constant 0 : index
    %116 = vector.load %arg8[%c3, %c0_48, %c0_49] : memref<4x8x32xbf16, #tpu.memory_space<vmem>>, vector<1x8x32xbf16>
    %117 = vector.shape_cast %116 : vector<1x8x32xbf16> to vector<8x32xbf16>
    %cst_50 = arith.constant dense<0.000000e+00> : vector<8x32xf32>
    %118 = tpu.matmul %115, %117, %cst_50 {dimension_numbers = #tpu.dot_dimension_numbers<[1], [0], [0], [1], [0, 0, 1, 1], [], []>} : vector<8x8xbf16>, vector<8x32xbf16>, vector<8x32xf32> -> vector<8x32xf32>
    %119 = arith.addf %95, %118 : vector<8x32xf32>
    %c0_51 = arith.constant 0 : index
    %c0_52 = arith.constant 0 : index
    %120 = vector.load %arg9[%c0_51, %c0_52] : memref<1x32xf32, #tpu.memory_space<vmem>>, vector<1x32xf32>
    %121 = vector.broadcast %120 : vector<1x32xf32> to vector<8x32xf32>
    %122 = arith.addf %119, %121 : vector<8x32xf32>
    %123 = arith.addf %1, %122 : vector<8x32xf32>
    %cst_53 = arith.constant dense<0.000000e+00> : vector<8xf32>
    %124 = vector.multi_reduction <add>, %123, %cst_53 [1] : vector<8x32xf32> to vector<8xf32>
    %125 = vector.shape_cast %124 : vector<8xf32> to vector<8x1xf32>
    %cst_54 = arith.constant 3.200000e+01 : f32
    %126 = vector.broadcast %cst_54 : f32 to vector<8x1xf32>
    %127 = arith.divf %125, %126 : vector<8x1xf32>
    %128 = vector.broadcast %127 : vector<8x1xf32> to vector<8x32xf32>
    %129 = arith.subf %123, %128 : vector<8x32xf32>
    %130 = arith.mulf %129, %129 : vector<8x32xf32>
    %cst_55 = arith.constant dense<0.000000e+00> : vector<8xf32>
    %131 = vector.multi_reduction <add>, %130, %cst_55 [1] : vector<8x32xf32> to vector<8xf32>
    %132 = vector.shape_cast %131 : vector<8xf32> to vector<8x1xf32>
    %cst_56 = arith.constant 3.200000e+01 : f32
    %133 = vector.broadcast %cst_56 : f32 to vector<8x1xf32>
    %134 = arith.divf %132, %133 : vector<8x1xf32>
    %135 = vector.broadcast %127 : vector<8x1xf32> to vector<8x32xf32>
    %136 = arith.subf %123, %135 : vector<8x32xf32>
    %cst_57 = arith.constant 9.99999974E-6 : f32
    %137 = vector.broadcast %cst_57 : f32 to vector<8x1xf32>
    %138 = arith.addf %134, %137 : vector<8x1xf32>
    %139 = math.rsqrt %138 : vector<8x1xf32>
    %140 = vector.broadcast %139 : vector<8x1xf32> to vector<8x32xf32>
    %141 = arith.mulf %136, %140 : vector<8x32xf32>
    %c0_58 = arith.constant 0 : index
    %c0_59 = arith.constant 0 : index
    %142 = vector.load %arg10[%c0_58, %c0_59] : memref<1x32xf32, #tpu.memory_space<vmem>>, vector<1x32xf32>
    %143 = vector.broadcast %142 : vector<1x32xf32> to vector<8x32xf32>
    %144 = arith.mulf %141, %143 : vector<8x32xf32>
    %c0_60 = arith.constant 0 : index
    %c0_61 = arith.constant 0 : index
    %145 = vector.load %arg11[%c0_60, %c0_61] : memref<1x32xf32, #tpu.memory_space<vmem>>, vector<1x32xf32>
    %146 = vector.broadcast %145 : vector<1x32xf32> to vector<8x32xf32>
    %147 = arith.addf %144, %146 : vector<8x32xf32>
    %c0_62 = arith.constant 0 : index
    %c0_63 = arith.constant 0 : index
    %c0_64 = arith.constant 0 : index
    %148 = vector.load %arg12[%c0_62, %c0_63, %c0_64] : memref<1x8x32xf32, #tpu.memory_space<vmem>>, vector<1x8x32xf32>
    %149 = vector.shape_cast %148 : vector<1x8x32xf32> to vector<8x32xf32>
    %150 = vector.shape_cast %147 : vector<8x32xf32> to vector<1x8x32xf32>
    tpu.vector_store %arg12[%c0_62, %c0_63, %c0_64], %150 {strides = array<i32>} : memref<1x8x32xf32, #tpu.memory_space<vmem>>, vector<1x8x32xf32>,
    return
  }
  func.func @transform_0(%arg0: i32) -> (i32, i32, i32) {
    %c0_i32 = arith.constant 0 : i32
    %c0_i32_0 = arith.constant 0 : i32
    %c0_i32_1 = arith.constant 0 : i32
    return %arg0, %c0_i32, %c0_i32_0 : i32, i32, i32
  }
  func.func @transform_1(%arg0: i32) -> (i32, i32, i32) {
    %c0_i32 = arith.constant 0 : i32
    %c0_i32_0 = arith.constant 0 : i32
    %c0_i32_1 = arith.constant 0 : i32
    return %arg0, %c0_i32, %c0_i32_0 : i32, i32, i32
  }
  func.func @transform_2(%arg0: i32) -> (i32, i32, i32) {
    %c0_i32 = arith.constant 0 : i32
    %c0_i32_0 = arith.constant 0 : i32
    %c0_i32_1 = arith.constant 0 : i32
    return %arg0, %c0_i32, %c0_i32_0 : i32, i32, i32
  }
  func.func @transform_3(%arg0: i32) -> (i32, i32) {
    %c0_i32 = arith.constant 0 : i32
    %c0_i32_0 = arith.constant 0 : i32
    %c0_i32_1 = arith.constant 0 : i32
    return %c0_i32, %c0_i32_0 : i32, i32
  }
  func.func @transform_4(%arg0: i32) -> (i32, i32) {
    %c0_i32 = arith.constant 0 : i32
    %c0_i32_0 = arith.constant 0 : i32
    %c0_i32_1 = arith.constant 0 : i32
    return %c0_i32, %c0_i32_0 : i32, i32
  }
  func.func @transform_5(%arg0: i32) -> (i32, i32) {
    %c0_i32 = arith.constant 0 : i32
    %c0_i32_0 = arith.constant 0 : i32
    %c0_i32_1 = arith.constant 0 : i32
    return %c0_i32, %c0_i32_0 : i32, i32
  }
  func.func @transform_6(%arg0: i32) -> (i32, i32) {
    %c0_i32 = arith.constant 0 : i32
    %c0_i32_0 = arith.constant 0 : i32
    %c0_i32_1 = arith.constant 0 : i32
    return %c0_i32, %c0_i32_0 : i32, i32
  }
  func.func @transform_7(%arg0: i32) -> (i32, i32, i32) {
    %c0_i32 = arith.constant 0 : i32
    %c0_i32_0 = arith.constant 0 : i32
    %c0_i32_1 = arith.constant 0 : i32
    %c0_i32_2 = arith.constant 0 : i32
    return %c0_i32, %c0_i32_0, %c0_i32_1 : i32, i32, i32
  }
  func.func @transform_8(%arg0: i32) -> (i32, i32) {
    %c0_i32 = arith.constant 0 : i32
    %c0_i32_0 = arith.constant 0 : i32
    %c0_i32_1 = arith.constant 0 : i32
    return %c0_i32, %c0_i32_0 : i32, i32
  }
  func.func @transform_9(%arg0: i32) -> (i32, i32) {
    %c0_i32 = arith.constant 0 : i32
    %c0_i32_0 = arith.constant 0 : i32
    %c0_i32_1 = arith.constant 0 : i32
    return %c0_i32, %c0_i32_0 : i32, i32
  }
  func.func @transform_10(%arg0: i32) -> (i32, i32) {
    %c0_i32 = arith.constant 0 : i32
    %c0_i32_0 = arith.constant 0 : i32
    %c0_i32_1 = arith.constant 0 : i32
    return %c0_i32, %c0_i32_0 : i32, i32
  }
  func.func @transform_11(%arg0: i32) -> (i32, i32, i32) {
    %c0_i32 = arith.constant 0 : i32
    %c0_i32_0 = arith.constant 0 : i32
    %c0_i32_1 = arith.constant 0 : i32
    return %arg0, %c0_i32, %c0_i32_0 : i32, i32, i32
  }
}

module attributes {stable_mosaic.version = 11 : i64} {
  func.func @_ffn_add_ln_kernel(%arg0: i32, %arg1: memref<8x32xf32, #tpu.memory_space<vmem>>, %arg2: memref<32x64xbf16, #tpu.memory_space<vmem>>, %arg3: memref<1x64xf32, #tpu.memory_space<vmem>>, %arg4: memref<64x32xbf16, #tpu.memory_space<vmem>>, %arg5: memref<1x32xf32, #tpu.memory_space<vmem>>, %arg6: memref<1x32xf32, #tpu.memory_space<vmem>>, %arg7: memref<1x32xf32, #tpu.memory_space<vmem>>, %arg8: memref<8x32xf32, #tpu.memory_space<vmem>>) attributes {dimension_semantics = [#tpu.dimension_semantics<parallel>], iteration_bounds = array<i64: 2>, scalar_prefetch = 0 : i64, scratch_operands = 0 : i64, tpu.core_type = #tpu.core_type<tc>, window_params = [{transform_indices = @transform_0, window_bounds = array<i64: 8, 32>}, {pipeline_mode = #tpu.pipeline_mode<synchronous>, transform_indices = @transform_1, window_bounds = array<i64: 32, 64>}, {pipeline_mode = #tpu.pipeline_mode<synchronous>, transform_indices = @transform_2, window_bounds = array<i64: 1, 64>}, {pipeline_mode = #tpu.pipeline_mode<synchronous>, transform_indices = @transform_3, window_bounds = array<i64: 64, 32>}, {pipeline_mode = #tpu.pipeline_mode<synchronous>, transform_indices = @transform_4, window_bounds = array<i64: 1, 32>}, {pipeline_mode = #tpu.pipeline_mode<synchronous>, transform_indices = @transform_5, window_bounds = array<i64: 1, 32>}, {pipeline_mode = #tpu.pipeline_mode<synchronous>, transform_indices = @transform_6, window_bounds = array<i64: 1, 32>}, {transform_indices = @transform_7, window_bounds = array<i64: 8, 32>}]} {
    %c0 = arith.constant 0 : index
    %c0_0 = arith.constant 0 : index
    %0 = vector.load %arg1[%c0, %c0_0] : memref<8x32xf32, #tpu.memory_space<vmem>>, vector<8x32xf32>
    %1 = arith.truncf %0 : vector<8x32xf32> to vector<8x32xbf16>
    %c0_1 = arith.constant 0 : index
    %c0_2 = arith.constant 0 : index
    %2 = vector.load %arg2[%c0_1, %c0_2] : memref<32x64xbf16, #tpu.memory_space<vmem>>, vector<32x64xbf16>
    %cst = arith.constant dense<0.000000e+00> : vector<8x64xf32>
    %3 = tpu.matmul %1, %2, %cst {dimension_numbers = #tpu.dot_dimension_numbers<[1], [0], [0], [1], [0, 0, 1, 1], [], []>} : vector<8x32xbf16>, vector<32x64xbf16>, vector<8x64xf32> -> vector<8x64xf32>
    %c0_3 = arith.constant 0 : index
    %c0_4 = arith.constant 0 : index
    %4 = vector.load %arg3[%c0_3, %c0_4] : memref<1x64xf32, #tpu.memory_space<vmem>>, vector<1x64xf32>
    %5 = vector.broadcast %4 : vector<1x64xf32> to vector<8x64xf32>
    %6 = arith.addf %3, %5 : vector<8x64xf32>
    %cst_5 = arith.constant 0.000000e+00 : f32
    %7 = vector.broadcast %cst_5 : f32 to vector<8x64xf32>
    %8 = arith.maximumf %6, %7 : vector<8x64xf32>
    %9 = arith.truncf %8 : vector<8x64xf32> to vector<8x64xbf16>
    %c0_6 = arith.constant 0 : index
    %c0_7 = arith.constant 0 : index
    %10 = vector.load %arg4[%c0_6, %c0_7] : memref<64x32xbf16, #tpu.memory_space<vmem>>, vector<64x32xbf16>
    %cst_8 = arith.constant dense<0.000000e+00> : vector<8x32xf32>
    %11 = tpu.matmul %9, %10, %cst_8 {dimension_numbers = #tpu.dot_dimension_numbers<[1], [0], [0], [1], [0, 0, 1, 1], [], []>} : vector<8x64xbf16>, vector<64x32xbf16>, vector<8x32xf32> -> vector<8x32xf32>
    %c0_9 = arith.constant 0 : index
    %c0_10 = arith.constant 0 : index
    %12 = vector.load %arg5[%c0_9, %c0_10] : memref<1x32xf32, #tpu.memory_space<vmem>>, vector<1x32xf32>
    %13 = vector.broadcast %12 : vector<1x32xf32> to vector<8x32xf32>
    %14 = arith.addf %11, %13 : vector<8x32xf32>
    %15 = arith.addf %0, %14 : vector<8x32xf32>
    %cst_11 = arith.constant dense<0.000000e+00> : vector<8xf32>
    %16 = vector.multi_reduction <add>, %15, %cst_11 [1] : vector<8x32xf32> to vector<8xf32>
    %17 = vector.shape_cast %16 : vector<8xf32> to vector<8x1xf32>
    %cst_12 = arith.constant 3.200000e+01 : f32
    %18 = vector.broadcast %cst_12 : f32 to vector<8x1xf32>
    %19 = arith.divf %17, %18 : vector<8x1xf32>
    %20 = vector.broadcast %19 : vector<8x1xf32> to vector<8x32xf32>
    %21 = arith.subf %15, %20 : vector<8x32xf32>
    %22 = arith.mulf %21, %21 : vector<8x32xf32>
    %cst_13 = arith.constant dense<0.000000e+00> : vector<8xf32>
    %23 = vector.multi_reduction <add>, %22, %cst_13 [1] : vector<8x32xf32> to vector<8xf32>
    %24 = vector.shape_cast %23 : vector<8xf32> to vector<8x1xf32>
    %cst_14 = arith.constant 3.200000e+01 : f32
    %25 = vector.broadcast %cst_14 : f32 to vector<8x1xf32>
    %26 = arith.divf %24, %25 : vector<8x1xf32>
    %27 = vector.broadcast %19 : vector<8x1xf32> to vector<8x32xf32>
    %28 = arith.subf %15, %27 : vector<8x32xf32>
    %cst_15 = arith.constant 9.99999974E-6 : f32
    %29 = vector.broadcast %cst_15 : f32 to vector<8x1xf32>
    %30 = arith.addf %26, %29 : vector<8x1xf32>
    %31 = math.rsqrt %30 : vector<8x1xf32>
    %32 = vector.broadcast %31 : vector<8x1xf32> to vector<8x32xf32>
    %33 = arith.mulf %28, %32 : vector<8x32xf32>
    %c0_16 = arith.constant 0 : index
    %c0_17 = arith.constant 0 : index
    %34 = vector.load %arg6[%c0_16, %c0_17] : memref<1x32xf32, #tpu.memory_space<vmem>>, vector<1x32xf32>
    %35 = vector.broadcast %34 : vector<1x32xf32> to vector<8x32xf32>
    %36 = arith.mulf %33, %35 : vector<8x32xf32>
    %c0_18 = arith.constant 0 : index
    %c0_19 = arith.constant 0 : index
    %37 = vector.load %arg7[%c0_18, %c0_19] : memref<1x32xf32, #tpu.memory_space<vmem>>, vector<1x32xf32>
    %38 = vector.broadcast %37 : vector<1x32xf32> to vector<8x32xf32>
    %39 = arith.addf %36, %38 : vector<8x32xf32>
    %c0_20 = arith.constant 0 : index
    %c0_21 = arith.constant 0 : index
    %40 = vector.load %arg8[%c0_20, %c0_21] : memref<8x32xf32, #tpu.memory_space<vmem>>, vector<8x32xf32>
    tpu.vector_store %arg8[%c0_20, %c0_21], %39 {strides = array<i32>} : memref<8x32xf32, #tpu.memory_space<vmem>>, vector<8x32xf32>,
    return
  }
  func.func @transform_0(%arg0: i32) -> (i32, i32) {
    %c0_i32 = arith.constant 0 : i32
    %c0_i32_0 = arith.constant 0 : i32
    return %arg0, %c0_i32 : i32, i32
  }
  func.func @transform_1(%arg0: i32) -> (i32, i32) {
    %c0_i32 = arith.constant 0 : i32
    %c0_i32_0 = arith.constant 0 : i32
    %c0_i32_1 = arith.constant 0 : i32
    return %c0_i32, %c0_i32_0 : i32, i32
  }
  func.func @transform_2(%arg0: i32) -> (i32, i32) {
    %c0_i32 = arith.constant 0 : i32
    %c0_i32_0 = arith.constant 0 : i32
    %c0_i32_1 = arith.constant 0 : i32
    return %c0_i32, %c0_i32_0 : i32, i32
  }
  func.func @transform_3(%arg0: i32) -> (i32, i32) {
    %c0_i32 = arith.constant 0 : i32
    %c0_i32_0 = arith.constant 0 : i32
    %c0_i32_1 = arith.constant 0 : i32
    return %c0_i32, %c0_i32_0 : i32, i32
  }
  func.func @transform_4(%arg0: i32) -> (i32, i32) {
    %c0_i32 = arith.constant 0 : i32
    %c0_i32_0 = arith.constant 0 : i32
    %c0_i32_1 = arith.constant 0 : i32
    return %c0_i32, %c0_i32_0 : i32, i32
  }
  func.func @transform_5(%arg0: i32) -> (i32, i32) {
    %c0_i32 = arith.constant 0 : i32
    %c0_i32_0 = arith.constant 0 : i32
    %c0_i32_1 = arith.constant 0 : i32
    return %c0_i32, %c0_i32_0 : i32, i32
  }
  func.func @transform_6(%arg0: i32) -> (i32, i32) {
    %c0_i32 = arith.constant 0 : i32
    %c0_i32_0 = arith.constant 0 : i32
    %c0_i32_1 = arith.constant 0 : i32
    return %c0_i32, %c0_i32_0 : i32, i32
  }
  func.func @transform_7(%arg0: i32) -> (i32, i32) {
    %c0_i32 = arith.constant 0 : i32
    %c0_i32_0 = arith.constant 0 : i32
    return %arg0, %c0_i32 : i32, i32
  }
}

module attributes {stable_mosaic.version = 11 : i64} {
  func.func @_ln_kernel(%arg0: i32, %arg1: memref<8x32xf32, #tpu.memory_space<vmem>>, %arg2: memref<1x32xf32, #tpu.memory_space<vmem>>, %arg3: memref<1x32xf32, #tpu.memory_space<vmem>>, %arg4: memref<8x32xf32, #tpu.memory_space<vmem>>) attributes {dimension_semantics = [#tpu.dimension_semantics<parallel>], iteration_bounds = array<i64: 2>, scalar_prefetch = 0 : i64, scratch_operands = 0 : i64, tpu.core_type = #tpu.core_type<tc>, window_params = [{transform_indices = @transform_0, window_bounds = array<i64: 8, 32>}, {pipeline_mode = #tpu.pipeline_mode<synchronous>, transform_indices = @transform_1, window_bounds = array<i64: 1, 32>}, {pipeline_mode = #tpu.pipeline_mode<synchronous>, transform_indices = @transform_2, window_bounds = array<i64: 1, 32>}, {transform_indices = @transform_3, window_bounds = array<i64: 8, 32>}]} {
    %c0 = arith.constant 0 : index
    %c0_0 = arith.constant 0 : index
    %0 = vector.load %arg1[%c0, %c0_0] : memref<8x32xf32, #tpu.memory_space<vmem>>, vector<8x32xf32>
    %cst = arith.constant dense<0.000000e+00> : vector<8xf32>
    %1 = vector.multi_reduction <add>, %0, %cst [1] : vector<8x32xf32> to vector<8xf32>
    %2 = vector.shape_cast %1 : vector<8xf32> to vector<8x1xf32>
    %cst_1 = arith.constant 3.200000e+01 : f32
    %3 = vector.broadcast %cst_1 : f32 to vector<8x1xf32>
    %4 = arith.divf %2, %3 : vector<8x1xf32>
    %5 = vector.broadcast %4 : vector<8x1xf32> to vector<8x32xf32>
    %6 = arith.subf %0, %5 : vector<8x32xf32>
    %7 = arith.mulf %6, %6 : vector<8x32xf32>
    %cst_2 = arith.constant dense<0.000000e+00> : vector<8xf32>
    %8 = vector.multi_reduction <add>, %7, %cst_2 [1] : vector<8x32xf32> to vector<8xf32>
    %9 = vector.shape_cast %8 : vector<8xf32> to vector<8x1xf32>
    %cst_3 = arith.constant 3.200000e+01 : f32
    %10 = vector.broadcast %cst_3 : f32 to vector<8x1xf32>
    %11 = arith.divf %9, %10 : vector<8x1xf32>
    %12 = vector.broadcast %4 : vector<8x1xf32> to vector<8x32xf32>
    %13 = arith.subf %0, %12 : vector<8x32xf32>
    %cst_4 = arith.constant 9.99999974E-6 : f32
    %14 = vector.broadcast %cst_4 : f32 to vector<8x1xf32>
    %15 = arith.addf %11, %14 : vector<8x1xf32>
    %16 = math.rsqrt %15 : vector<8x1xf32>
    %17 = vector.broadcast %16 : vector<8x1xf32> to vector<8x32xf32>
    %18 = arith.mulf %13, %17 : vector<8x32xf32>
    %c0_5 = arith.constant 0 : index
    %c0_6 = arith.constant 0 : index
    %19 = vector.load %arg2[%c0_5, %c0_6] : memref<1x32xf32, #tpu.memory_space<vmem>>, vector<1x32xf32>
    %20 = vector.broadcast %19 : vector<1x32xf32> to vector<8x32xf32>
    %21 = arith.mulf %18, %20 : vector<8x32xf32>
    %c0_7 = arith.constant 0 : index
    %c0_8 = arith.constant 0 : index
    %22 = vector.load %arg3[%c0_7, %c0_8] : memref<1x32xf32, #tpu.memory_space<vmem>>, vector<1x32xf32>
    %23 = vector.broadcast %22 : vector<1x32xf32> to vector<8x32xf32>
    %24 = arith.addf %21, %23 : vector<8x32xf32>
    %c0_9 = arith.constant 0 : index
    %c0_10 = arith.constant 0 : index
    %25 = vector.load %arg4[%c0_9, %c0_10] : memref<8x32xf32, #tpu.memory_space<vmem>>, vector<8x32xf32>
    tpu.vector_store %arg4[%c0_9, %c0_10], %24 {strides = array<i32>} : memref<8x32xf32, #tpu.memory_space<vmem>>, vector<8x32xf32>,
    return
  }
  func.func @transform_0(%arg0: i32) -> (i32, i32) {
    %c0_i32 = arith.constant 0 : i32
    %c0_i32_0 = arith.constant 0 : i32
    return %arg0, %c0_i32 : i32, i32
  }
  func.func @transform_1(%arg0: i32) -> (i32, i32) {
    %c0_i32 = arith.constant 0 : i32
    %c0_i32_0 = arith.constant 0 : i32
    %c0_i32_1 = arith.constant 0 : i32
    return %c0_i32, %c0_i32_0 : i32, i32
  }
  func.func @transform_2(%arg0: i32) -> (i32, i32) {
    %c0_i32 = arith.constant 0 : i32
    %c0_i32_0 = arith.constant 0 : i32
    %c0_i32_1 = arith.constant 0 : i32
    return %c0_i32, %c0_i32_0 : i32, i32
  }
  func.func @transform_3(%arg0: i32) -> (i32, i32) {
    %c0_i32 = arith.constant 0 : i32
    %c0_i32_0 = arith.constant 0 : i32
    return %arg0, %c0_i32 : i32, i32
  }
}

module attributes {stable_mosaic.version = 11 : i64} {
  func.func @_linear_kernel(%arg0: i32, %arg1: i32, %arg2: memref<8x32xf32, #tpu.memory_space<vmem>>, %arg3: memref<32x60xbf16, #tpu.memory_space<vmem>>, %arg4: memref<1x60xf32, #tpu.memory_space<vmem>>, %arg5: memref<8x60xf32, #tpu.memory_space<vmem>>) attributes {dimension_semantics = [#tpu.dimension_semantics<parallel>, #tpu.dimension_semantics<parallel>], iteration_bounds = array<i64: 2, 1>, scalar_prefetch = 0 : i64, scratch_operands = 0 : i64, tpu.core_type = #tpu.core_type<tc>, window_params = [{transform_indices = @transform_0, window_bounds = array<i64: 8, 32>}, {transform_indices = @transform_1, window_bounds = array<i64: 32, 60>}, {transform_indices = @transform_2, window_bounds = array<i64: 1, 60>}, {transform_indices = @transform_3, window_bounds = array<i64: 8, 60>}]} {
    %c0 = arith.constant 0 : index
    %c0_0 = arith.constant 0 : index
    %0 = vector.load %arg2[%c0, %c0_0] : memref<8x32xf32, #tpu.memory_space<vmem>>, vector<8x32xf32>
    %1 = arith.truncf %0 : vector<8x32xf32> to vector<8x32xbf16>
    %c0_1 = arith.constant 0 : index
    %c0_2 = arith.constant 0 : index
    %2 = vector.load %arg3[%c0_1, %c0_2] : memref<32x60xbf16, #tpu.memory_space<vmem>>, vector<32x60xbf16>
    %cst = arith.constant dense<0.000000e+00> : vector<8x60xf32>
    %3 = tpu.matmul %1, %2, %cst {dimension_numbers = #tpu.dot_dimension_numbers<[1], [0], [0], [1], [0, 0, 1, 1], [], []>} : vector<8x32xbf16>, vector<32x60xbf16>, vector<8x60xf32> -> vector<8x60xf32>
    %c0_3 = arith.constant 0 : index
    %c0_4 = arith.constant 0 : index
    %4 = vector.load %arg4[%c0_3, %c0_4] : memref<1x60xf32, #tpu.memory_space<vmem>>, vector<1x60xf32>
    %5 = vector.broadcast %4 : vector<1x60xf32> to vector<8x60xf32>
    %6 = arith.addf %3, %5 : vector<8x60xf32>
    %c0_5 = arith.constant 0 : index
    %c0_6 = arith.constant 0 : index
    %7 = vector.load %arg5[%c0_5, %c0_6] : memref<8x60xf32, #tpu.memory_space<vmem>>, vector<8x60xf32>
    tpu.vector_store %arg5[%c0_5, %c0_6], %6 {strides = array<i32>} : memref<8x60xf32, #tpu.memory_space<vmem>>, vector<8x60xf32>,
    return
  }
  func.func @transform_0(%arg0: i32, %arg1: i32) -> (i32, i32) {
    %c0_i32 = arith.constant 0 : i32
    %c0_i32_0 = arith.constant 0 : i32
    return %arg0, %c0_i32 : i32, i32
  }
  func.func @transform_1(%arg0: i32, %arg1: i32) -> (i32, i32) {
    %c0_i32 = arith.constant 0 : i32
    %c0_i32_0 = arith.constant 0 : i32
    return %c0_i32, %arg1 : i32, i32
  }
  func.func @transform_2(%arg0: i32, %arg1: i32) -> (i32, i32) {
    %c0_i32 = arith.constant 0 : i32
    %c0_i32_0 = arith.constant 0 : i32
    return %c0_i32, %arg1 : i32, i32
  }
  func.func @transform_3(%arg0: i32, %arg1: i32) -> (i32, i32) {
    %c0_i32 = arith.constant 0 : i32
    return %arg0, %arg1 : i32, i32
  }
}

module attributes {stable_mosaic.version = 11 : i64} {
  func.func @_mha_add_ln_kernel(%arg0: i32, %arg1: memref<1x8x32xf32, #tpu.memory_space<vmem>>, %arg2: memref<1x8x32xf32, #tpu.memory_space<vmem>>, %arg3: memref<1x8x8xf32, #tpu.memory_space<vmem>>, %arg4: memref<32x32xbf16, #tpu.memory_space<vmem>>, %arg5: memref<32x64xbf16, #tpu.memory_space<vmem>>, %arg6: memref<1x32xf32, #tpu.memory_space<vmem>>, %arg7: memref<1x64xf32, #tpu.memory_space<vmem>>, %arg8: memref<4x8x32xbf16, #tpu.memory_space<vmem>>, %arg9: memref<1x32xf32, #tpu.memory_space<vmem>>, %arg10: memref<1x32xf32, #tpu.memory_space<vmem>>, %arg11: memref<1x32xf32, #tpu.memory_space<vmem>>, %arg12: memref<1x8x32xf32, #tpu.memory_space<vmem>>) attributes {dimension_semantics = [#tpu.dimension_semantics<parallel>], iteration_bounds = array<i64: 2>, scalar_prefetch = 0 : i64, scratch_operands = 0 : i64, tpu.core_type = #tpu.core_type<tc>, window_params = [{transform_indices = @transform_0, window_bounds = array<i64: 1, 8, 32>}, {transform_indices = @transform_1, window_bounds = array<i64: 1, 8, 32>}, {transform_indices = @transform_2, window_bounds = array<i64: 1, 8, 8>}, {pipeline_mode = #tpu.pipeline_mode<synchronous>, transform_indices = @transform_3, window_bounds = array<i64: 32, 32>}, {pipeline_mode = #tpu.pipeline_mode<synchronous>, transform_indices = @transform_4, window_bounds = array<i64: 32, 64>}, {pipeline_mode = #tpu.pipeline_mode<synchronous>, transform_indices = @transform_5, window_bounds = array<i64: 1, 32>}, {pipeline_mode = #tpu.pipeline_mode<synchronous>, transform_indices = @transform_6, window_bounds = array<i64: 1, 64>}, {pipeline_mode = #tpu.pipeline_mode<synchronous>, transform_indices = @transform_7, window_bounds = array<i64: 4, 8, 32>}, {pipeline_mode = #tpu.pipeline_mode<synchronous>, transform_indices = @transform_8, window_bounds = array<i64: 1, 32>}, {pipeline_mode = #tpu.pipeline_mode<synchronous>, transform_indices = @transform_9, window_bounds = array<i64: 1, 32>}, {pipeline_mode = #tpu.pipeline_mode<synchronous>, transform_indices = @transform_10, window_bounds = array<i64: 1, 32>}, {transform_indices = @transform_11, window_bounds = array<i64: 1, 8, 32>}]} {
    %c0 = arith.constant 0 : index
    %c0_0 = arith.constant 0 : index
    %c0_1 = arith.constant 0 : index
    %0 = vector.load %arg1[%c0, %c0_0, %c0_1] : memref<1x8x32xf32, #tpu.memory_space<vmem>>, vector<1x8x32xf32>
    %1 = vector.shape_cast %0 : vector<1x8x32xf32> to vector<8x32xf32>
    %c0_2 = arith.constant 0 : index
    %c0_3 = arith.constant 0 : index
    %c0_4 = arith.constant 0 : index
    %2 = vector.load %arg2[%c0_2, %c0_3, %c0_4] : memref<1x8x32xf32, #tpu.memory_space<vmem>>, vector<1x8x32xf32>
    %3 = vector.shape_cast %2 : vector<1x8x32xf32> to vector<8x32xf32>
    %c0_5 = arith.constant 0 : index
    %c0_6 = arith.constant 0 : index
    %c0_7 = arith.constant 0 : index
    %4 = vector.load %arg3[%c0_5, %c0_6, %c0_7] : memref<1x8x8xf32, #tpu.memory_space<vmem>>, vector<1x8x8xf32>
    %5 = vector.shape_cast %4 : vector<1x8x8xf32> to vector<8x8xf32>
    %6 = arith.truncf %1 : vector<8x32xf32> to vector<8x32xbf16>
    %c0_8 = arith.constant 0 : index
    %c0_9 = arith.constant 0 : index
    %7 = vector.load %arg4[%c0_8, %c0_9] : memref<32x32xbf16, #tpu.memory_space<vmem>>, vector<32x32xbf16>
    %cst = arith.constant dense<0.000000e+00> : vector<8x32xf32>
    %8 = tpu.matmul %6, %7, %cst {dimension_numbers = #tpu.dot_dimension_numbers<[1], [0], [0], [1], [0, 0, 1, 1], [], []>} : vector<8x32xbf16>, vector<32x32xbf16>, vector<8x32xf32> -> vector<8x32xf32>
    %c0_10 = arith.constant 0 : index
    %c0_11 = arith.constant 0 : index
    %9 = vector.load %arg6[%c0_10, %c0_11] : memref<1x32xf32, #tpu.memory_space<vmem>>, vector<1x32xf32>
    %10 = vector.broadcast %9 : vector<1x32xf32> to vector<8x32xf32>
    %11 = arith.addf %8, %10 : vector<8x32xf32>
    %12 = arith.truncf %3 : vector<8x32xf32> to vector<8x32xbf16>
    %c0_12 = arith.constant 0 : index
    %c0_13 = arith.constant 0 : index
    %13 = vector.load %arg5[%c0_12, %c0_13] : memref<32x64xbf16, #tpu.memory_space<vmem>>, vector<32x64xbf16>
    %cst_14 = arith.constant dense<0.000000e+00> : vector<8x64xf32>
    %14 = tpu.matmul %12, %13, %cst_14 {dimension_numbers = #tpu.dot_dimension_numbers<[1], [0], [0], [1], [0, 0, 1, 1], [], []>} : vector<8x32xbf16>, vector<32x64xbf16>, vector<8x64xf32> -> vector<8x64xf32>
    %c0_15 = arith.constant 0 : index
    %c0_16 = arith.constant 0 : index
    %15 = vector.load %arg7[%c0_15, %c0_16] : memref<1x64xf32, #tpu.memory_space<vmem>>, vector<1x64xf32>
    %16 = vector.broadcast %15 : vector<1x64xf32> to vector<8x64xf32>
    %17 = arith.addf %14, %16 : vector<8x64xf32>
    %18 = vector.extract_strided_slice %17 {offsets = [0, 0], sizes = [8, 32], strides = [1, 1]} : vector<8x64xf32> to vector<8x32xf32>
    %19 = vector.extract_strided_slice %17 {offsets = [0, 32], sizes = [8, 32], strides = [1, 1]} : vector<8x64xf32> to vector<8x32xf32>
    %20 = arith.truncf %11 : vector<8x32xf32> to vector<8x32xbf16>
    %21 = arith.truncf %18 : vector<8x32xf32> to vector<8x32xbf16>
    %22 = arith.truncf %19 : vector<8x32xf32> to vector<8x32xbf16>
    %cst_17 = arith.constant 0.000000e+00 : f32
    %23 = vector.broadcast %cst_17 : f32 to vector<8x32xf32>
    %24 = vector.extract_strided_slice %20 {offsets = [0, 0], sizes = [8, 8], strides = [1, 1]} : vector<8x32xbf16> to vector<8x8xbf16>
    %25 = vector.extract_strided_slice %21 {offsets = [0, 0], sizes = [8, 8], strides = [1, 1]} : vector<8x32xbf16> to vector<8x8xbf16>
    %26 = vector.extract_strided_slice %22 {offsets = [0, 0], sizes = [8, 8], strides = [1, 1]} : vector<8x32xbf16> to vector<8x8xbf16>
    %cst_18 = arith.constant dense<0.000000e+00> : vector<8x8xf32>
    %27 = tpu.matmul %24, %25, %cst_18 {dimension_numbers = #tpu.dot_dimension_numbers<[1], [1], [0], [0], [0, 0, 1, 0], [], []>} : vector<8x8xbf16>, vector<8x8xbf16>, vector<8x8xf32> -> vector<8x8xf32>
    %cst_19 = arith.constant 0.353553385 : f32
    %28 = vector.broadcast %cst_19 : f32 to vector<8x8xf32>
    %29 = arith.mulf %27, %28 : vector<8x8xf32>
    %30 = arith.addf %29, %5 : vector<8x8xf32>
    %cst_20 = arith.constant dense<0xFF800000> : vector<8xf32>
    %31 = vector.multi_reduction <maximumf>, %30, %cst_20 [1] : vector<8x8xf32> to vector<8xf32>
    %32 = vector.shape_cast %31 : vector<8xf32> to vector<8x1xf32>
    %33 = vector.broadcast %32 : vector<8x1xf32> to vector<8x8xf32>
    %34 = arith.subf %30, %33 : vector<8x8xf32>
    %35 = math.exp %34 : vector<8x8xf32>
    %cst_21 = arith.constant dense<0.000000e+00> : vector<8xf32>
    %36 = vector.multi_reduction <add>, %35, %cst_21 [1] : vector<8x8xf32> to vector<8xf32>
    %37 = vector.shape_cast %36 : vector<8xf32> to vector<8x1xf32>
    %38 = tpu.reciprocal %37 {approx = true} : vector<8x1xf32> -> vector<8x1xf32>
    %39 = vector.broadcast %38 : vector<8x1xf32> to vector<8x8xf32>
    %40 = arith.mulf %35, %39 : vector<8x8xf32>
    %41 = arith.truncf %40 : vector<8x8xf32> to vector<8x8xbf16>
    %cst_22 = arith.constant dense<0.000000e+00> : vector<8x8xf32>
    %42 = tpu.matmul %41, %26, %cst_22 {dimension_numbers = #tpu.dot_dimension_numbers<[1], [0], [0], [1], [0, 0, 1, 1], [], []>} : vector<8x8xbf16>, vector<8x8xbf16>, vector<8x8xf32> -> vector<8x8xf32>
    %43 = arith.truncf %42 : vector<8x8xf32> to vector<8x8xbf16>
    %c0_23 = arith.constant 0 : index
    %c0_24 = arith.constant 0 : index
    %c0_25 = arith.constant 0 : index
    %44 = vector.load %arg8[%c0_23, %c0_24, %c0_25] : memref<4x8x32xbf16, #tpu.memory_space<vmem>>, vector<1x8x32xbf16>
    %45 = vector.shape_cast %44 : vector<1x8x32xbf16> to vector<8x32xbf16>
    %cst_26 = arith.constant dense<0.000000e+00> : vector<8x32xf32>
    %46 = tpu.matmul %43, %45, %cst_26 {dimension_numbers = #tpu.dot_dimension_numbers<[1], [0], [0], [1], [0, 0, 1, 1], [], []>} : vector<8x8xbf16>, vector<8x32xbf16>, vector<8x32xf32> -> vector<8x32xf32>
    %47 = arith.addf %23, %46 : vector<8x32xf32>
    %48 = vector.extract_strided_slice %20 {offsets = [0, 8], sizes = [8, 8], strides = [1, 1]} : vector<8x32xbf16> to vector<8x8xbf16>
    %49 = vector.extract_strided_slice %21 {offsets = [0, 8], sizes = [8, 8], strides = [1, 1]} : vector<8x32xbf16> to vector<8x8xbf16>
    %50 = vector.extract_strided_slice %22 {offsets = [0, 8], sizes = [8, 8], strides = [1, 1]} : vector<8x32xbf16> to vector<8x8xbf16>
    %cst_27 = arith.constant dense<0.000000e+00> : vector<8x8xf32>
    %51 = tpu.matmul %48, %49, %cst_27 {dimension_numbers = #tpu.dot_dimension_numbers<[1], [1], [0], [0], [0, 0, 1, 0], [], []>} : vector<8x8xbf16>, vector<8x8xbf16>, vector<8x8xf32> -> vector<8x8xf32>
    %cst_28 = arith.constant 0.353553385 : f32
    %52 = vector.broadcast %cst_28 : f32 to vector<8x8xf32>
    %53 = arith.mulf %51, %52 : vector<8x8xf32>
    %54 = arith.addf %53, %5 : vector<8x8xf32>
    %cst_29 = arith.constant dense<0xFF800000> : vector<8xf32>
    %55 = vector.multi_reduction <maximumf>, %54, %cst_29 [1] : vector<8x8xf32> to vector<8xf32>
    %56 = vector.shape_cast %55 : vector<8xf32> to vector<8x1xf32>
    %57 = vector.broadcast %56 : vector<8x1xf32> to vector<8x8xf32>
    %58 = arith.subf %54, %57 : vector<8x8xf32>
    %59 = math.exp %58 : vector<8x8xf32>
    %cst_30 = arith.constant dense<0.000000e+00> : vector<8xf32>
    %60 = vector.multi_reduction <add>, %59, %cst_30 [1] : vector<8x8xf32> to vector<8xf32>
    %61 = vector.shape_cast %60 : vector<8xf32> to vector<8x1xf32>
    %62 = tpu.reciprocal %61 {approx = true} : vector<8x1xf32> -> vector<8x1xf32>
    %63 = vector.broadcast %62 : vector<8x1xf32> to vector<8x8xf32>
    %64 = arith.mulf %59, %63 : vector<8x8xf32>
    %65 = arith.truncf %64 : vector<8x8xf32> to vector<8x8xbf16>
    %cst_31 = arith.constant dense<0.000000e+00> : vector<8x8xf32>
    %66 = tpu.matmul %65, %50, %cst_31 {dimension_numbers = #tpu.dot_dimension_numbers<[1], [0], [0], [1], [0, 0, 1, 1], [], []>} : vector<8x8xbf16>, vector<8x8xbf16>, vector<8x8xf32> -> vector<8x8xf32>
    %67 = arith.truncf %66 : vector<8x8xf32> to vector<8x8xbf16>
    %c1 = arith.constant 1 : index
    %c0_32 = arith.constant 0 : index
    %c0_33 = arith.constant 0 : index
    %68 = vector.load %arg8[%c1, %c0_32, %c0_33] : memref<4x8x32xbf16, #tpu.memory_space<vmem>>, vector<1x8x32xbf16>
    %69 = vector.shape_cast %68 : vector<1x8x32xbf16> to vector<8x32xbf16>
    %cst_34 = arith.constant dense<0.000000e+00> : vector<8x32xf32>
    %70 = tpu.matmul %67, %69, %cst_34 {dimension_numbers = #tpu.dot_dimension_numbers<[1], [0], [0], [1], [0, 0, 1, 1], [], []>} : vector<8x8xbf16>, vector<8x32xbf16>, vector<8x32xf32> -> vector<8x32xf32>
    %71 = arith.addf %47, %70 : vector<8x32xf32>
    %72 = vector.extract_strided_slice %20 {offsets = [0, 16], sizes = [8, 8], strides = [1, 1]} : vector<8x32xbf16> to vector<8x8xbf16>
    %73 = vector.extract_strided_slice %21 {offsets = [0, 16], sizes = [8, 8], strides = [1, 1]} : vector<8x32xbf16> to vector<8x8xbf16>
    %74 = vector.extract_strided_slice %22 {offsets = [0, 16], sizes = [8, 8], strides = [1, 1]} : vector<8x32xbf16> to vector<8x8xbf16>
    %cst_35 = arith.constant dense<0.000000e+00> : vector<8x8xf32>
    %75 = tpu.matmul %72, %73, %cst_35 {dimension_numbers = #tpu.dot_dimension_numbers<[1], [1], [0], [0], [0, 0, 1, 0], [], []>} : vector<8x8xbf16>, vector<8x8xbf16>, vector<8x8xf32> -> vector<8x8xf32>
    %cst_36 = arith.constant 0.353553385 : f32
    %76 = vector.broadcast %cst_36 : f32 to vector<8x8xf32>
    %77 = arith.mulf %75, %76 : vector<8x8xf32>
    %78 = arith.addf %77, %5 : vector<8x8xf32>
    %cst_37 = arith.constant dense<0xFF800000> : vector<8xf32>
    %79 = vector.multi_reduction <maximumf>, %78, %cst_37 [1] : vector<8x8xf32> to vector<8xf32>
    %80 = vector.shape_cast %79 : vector<8xf32> to vector<8x1xf32>
    %81 = vector.broadcast %80 : vector<8x1xf32> to vector<8x8xf32>
    %82 = arith.subf %78, %81 : vector<8x8xf32>
    %83 = math.exp %82 : vector<8x8xf32>
    %cst_38 = arith.constant dense<0.000000e+00> : vector<8xf32>
    %84 = vector.multi_reduction <add>, %83, %cst_38 [1] : vector<8x8xf32> to vector<8xf32>
    %85 = vector.shape_cast %84 : vector<8xf32> to vector<8x1xf32>
    %86 = tpu.reciprocal %85 {approx = true} : vector<8x1xf32> -> vector<8x1xf32>
    %87 = vector.broadcast %86 : vector<8x1xf32> to vector<8x8xf32>
    %88 = arith.mulf %83, %87 : vector<8x8xf32>
    %89 = arith.truncf %88 : vector<8x8xf32> to vector<8x8xbf16>
    %cst_39 = arith.constant dense<0.000000e+00> : vector<8x8xf32>
    %90 = tpu.matmul %89, %74, %cst_39 {dimension_numbers = #tpu.dot_dimension_numbers<[1], [0], [0], [1], [0, 0, 1, 1], [], []>} : vector<8x8xbf16>, vector<8x8xbf16>, vector<8x8xf32> -> vector<8x8xf32>
    %91 = arith.truncf %90 : vector<8x8xf32> to vector<8x8xbf16>
    %c2 = arith.constant 2 : index
    %c0_40 = arith.constant 0 : index
    %c0_41 = arith.constant 0 : index
    %92 = vector.load %arg8[%c2, %c0_40, %c0_41] : memref<4x8x32xbf16, #tpu.memory_space<vmem>>, vector<1x8x32xbf16>
    %93 = vector.shape_cast %92 : vector<1x8x32xbf16> to vector<8x32xbf16>
    %cst_42 = arith.constant dense<0.000000e+00> : vector<8x32xf32>
    %94 = tpu.matmul %91, %93, %cst_42 {dimension_numbers = #tpu.dot_dimension_numbers<[1], [0], [0], [1], [0, 0, 1, 1], [], []>} : vector<8x8xbf16>, vector<8x32xbf16>, vector<8x32xf32> -> vector<8x32xf32>
    %95 = arith.addf %71, %94 : vector<8x32xf32>
    %96 = vector.extract_strided_slice %20 {offsets = [0, 24], sizes = [8, 8], strides = [1, 1]} : vector<8x32xbf16> to vector<8x8xbf16>
    %97 = vector.extract_strided_slice %21 {offsets = [0, 24], sizes = [8, 8], strides = [1, 1]} : vector<8x32xbf16> to vector<8x8xbf16>
    %98 = vector.extract_strided_slice %22 {offsets = [0, 24], sizes = [8, 8], strides = [1, 1]} : vector<8x32xbf16> to vector<8x8xbf16>
    %cst_43 = arith.constant dense<0.000000e+00> : vector<8x8xf32>
    %99 = tpu.matmul %96, %97, %cst_43 {dimension_numbers = #tpu.dot_dimension_numbers<[1], [1], [0], [0], [0, 0, 1, 0], [], []>} : vector<8x8xbf16>, vector<8x8xbf16>, vector<8x8xf32> -> vector<8x8xf32>
    %cst_44 = arith.constant 0.353553385 : f32
    %100 = vector.broadcast %cst_44 : f32 to vector<8x8xf32>
    %101 = arith.mulf %99, %100 : vector<8x8xf32>
    %102 = arith.addf %101, %5 : vector<8x8xf32>
    %cst_45 = arith.constant dense<0xFF800000> : vector<8xf32>
    %103 = vector.multi_reduction <maximumf>, %102, %cst_45 [1] : vector<8x8xf32> to vector<8xf32>
    %104 = vector.shape_cast %103 : vector<8xf32> to vector<8x1xf32>
    %105 = vector.broadcast %104 : vector<8x1xf32> to vector<8x8xf32>
    %106 = arith.subf %102, %105 : vector<8x8xf32>
    %107 = math.exp %106 : vector<8x8xf32>
    %cst_46 = arith.constant dense<0.000000e+00> : vector<8xf32>
    %108 = vector.multi_reduction <add>, %107, %cst_46 [1] : vector<8x8xf32> to vector<8xf32>
    %109 = vector.shape_cast %108 : vector<8xf32> to vector<8x1xf32>
    %110 = tpu.reciprocal %109 {approx = true} : vector<8x1xf32> -> vector<8x1xf32>
    %111 = vector.broadcast %110 : vector<8x1xf32> to vector<8x8xf32>
    %112 = arith.mulf %107, %111 : vector<8x8xf32>
    %113 = arith.truncf %112 : vector<8x8xf32> to vector<8x8xbf16>
    %cst_47 = arith.constant dense<0.000000e+00> : vector<8x8xf32>
    %114 = tpu.matmul %113, %98, %cst_47 {dimension_numbers = #tpu.dot_dimension_numbers<[1], [0], [0], [1], [0, 0, 1, 1], [], []>} : vector<8x8xbf16>, vector<8x8xbf16>, vector<8x8xf32> -> vector<8x8xf32>
    %115 = arith.truncf %114 : vector<8x8xf32> to vector<8x8xbf16>
    %c3 = arith.constant 3 : index
    %c0_48 = arith.constant 0 : index
    %c0_49 = arith.constant 0 : index
    %116 = vector.load %arg8[%c3, %c0_48, %c0_49] : memref<4x8x32xbf16, #tpu.memory_space<vmem>>, vector<1x8x32xbf16>
    %117 = vector.shape_cast %116 : vector<1x8x32xbf16> to vector<8x32xbf16>
    %cst_50 = arith.constant dense<0.000000e+00> : vector<8x32xf32>
    %118 = tpu.matmul %115, %117, %cst_50 {dimension_numbers = #tpu.dot_dimension_numbers<[1], [0], [0], [1], [0, 0, 1, 1], [], []>} : vector<8x8xbf16>, vector<8x32xbf16>, vector<8x32xf32> -> vector<8x32xf32>
    %119 = arith.addf %95, %118 : vector<8x32xf32>
    %c0_51 = arith.constant 0 : index
    %c0_52 = arith.constant 0 : index
    %120 = vector.load %arg9[%c0_51, %c0_52] : memref<1x32xf32, #tpu.memory_space<vmem>>, vector<1x32xf32>
    %121 = vector.broadcast %120 : vector<1x32xf32> to vector<8x32xf32>
    %122 = arith.addf %119, %121 : vector<8x32xf32>
    %123 = arith.addf %1, %122 : vector<8x32xf32>
    %cst_53 = arith.constant dense<0.000000e+00> : vector<8xf32>
    %124 = vector.multi_reduction <add>, %123, %cst_53 [1] : vector<8x32xf32> to vector<8xf32>
    %125 = vector.shape_cast %124 : vector<8xf32> to vector<8x1xf32>
    %cst_54 = arith.constant 3.200000e+01 : f32
    %126 = vector.broadcast %cst_54 : f32 to vector<8x1xf32>
    %127 = arith.divf %125, %126 : vector<8x1xf32>
    %128 = vector.broadcast %127 : vector<8x1xf32> to vector<8x32xf32>
    %129 = arith.subf %123, %128 : vector<8x32xf32>
    %130 = arith.mulf %129, %129 : vector<8x32xf32>
    %cst_55 = arith.constant dense<0.000000e+00> : vector<8xf32>
    %131 = vector.multi_reduction <add>, %130, %cst_55 [1] : vector<8x32xf32> to vector<8xf32>
    %132 = vector.shape_cast %131 : vector<8xf32> to vector<8x1xf32>
    %cst_56 = arith.constant 3.200000e+01 : f32
    %133 = vector.broadcast %cst_56 : f32 to vector<8x1xf32>
    %134 = arith.divf %132, %133 : vector<8x1xf32>
    %135 = vector.broadcast %127 : vector<8x1xf32> to vector<8x32xf32>
    %136 = arith.subf %123, %135 : vector<8x32xf32>
    %cst_57 = arith.constant 9.99999974E-6 : f32
    %137 = vector.broadcast %cst_57 : f32 to vector<8x1xf32>
    %138 = arith.addf %134, %137 : vector<8x1xf32>
    %139 = math.rsqrt %138 : vector<8x1xf32>
    %140 = vector.broadcast %139 : vector<8x1xf32> to vector<8x32xf32>
    %141 = arith.mulf %136, %140 : vector<8x32xf32>
    %c0_58 = arith.constant 0 : index
    %c0_59 = arith.constant 0 : index
    %142 = vector.load %arg10[%c0_58, %c0_59] : memref<1x32xf32, #tpu.memory_space<vmem>>, vector<1x32xf32>
    %143 = vector.broadcast %142 : vector<1x32xf32> to vector<8x32xf32>
    %144 = arith.mulf %141, %143 : vector<8x32xf32>
    %c0_60 = arith.constant 0 : index
    %c0_61 = arith.constant 0 : index
    %145 = vector.load %arg11[%c0_60, %c0_61] : memref<1x32xf32, #tpu.memory_space<vmem>>, vector<1x32xf32>
    %146 = vector.broadcast %145 : vector<1x32xf32> to vector<8x32xf32>
    %147 = arith.addf %144, %146 : vector<8x32xf32>
    %c0_62 = arith.constant 0 : index
    %c0_63 = arith.constant 0 : index
    %c0_64 = arith.constant 0 : index
    %148 = vector.load %arg12[%c0_62, %c0_63, %c0_64] : memref<1x8x32xf32, #tpu.memory_space<vmem>>, vector<1x8x32xf32>
    %149 = vector.shape_cast %148 : vector<1x8x32xf32> to vector<8x32xf32>
    %150 = vector.shape_cast %147 : vector<8x32xf32> to vector<1x8x32xf32>
    tpu.vector_store %arg12[%c0_62, %c0_63, %c0_64], %150 {strides = array<i32>} : memref<1x8x32xf32, #tpu.memory_space<vmem>>, vector<1x8x32xf32>,
    return
  }
  func.func @transform_0(%arg0: i32) -> (i32, i32, i32) {
    %c0_i32 = arith.constant 0 : i32
    %c0_i32_0 = arith.constant 0 : i32
    %c0_i32_1 = arith.constant 0 : i32
    return %arg0, %c0_i32, %c0_i32_0 : i32, i32, i32
  }
  func.func @transform_1(%arg0: i32) -> (i32, i32, i32) {
    %c0_i32 = arith.constant 0 : i32
    %c0_i32_0 = arith.constant 0 : i32
    %c0_i32_1 = arith.constant 0 : i32
    return %arg0, %c0_i32, %c0_i32_0 : i32, i32, i32
  }
  func.func @transform_2(%arg0: i32) -> (i32, i32, i32) {
    %c0_i32 = arith.constant 0 : i32
    %c0_i32_0 = arith.constant 0 : i32
    %c0_i32_1 = arith.constant 0 : i32
    return %arg0, %c0_i32, %c0_i32_0 : i32, i32, i32
  }
  func.func @transform_3(%arg0: i32) -> (i32, i32) {
    %c0_i32 = arith.constant 0 : i32
    %c0_i32_0 = arith.constant 0 : i32
    %c0_i32_1 = arith.constant 0 : i32
    return %c0_i32, %c0_i32_0 : i32, i32
  }
  func.func @transform_4(%arg0: i32) -> (i32, i32) {
    %c0_i32 = arith.constant 0 : i32
    %c0_i32_0 = arith.constant 0 : i32
    %c0_i32_1 = arith.constant 0 : i32
    return %c0_i32, %c0_i32_0 : i32, i32
  }
  func.func @transform_5(%arg0: i32) -> (i32, i32) {
    %c0_i32 = arith.constant 0 : i32
    %c0_i32_0 = arith.constant 0 : i32
    %c0_i32_1 = arith.constant 0 : i32
    return %c0_i32, %c0_i32_0 : i32, i32
  }
  func.func @transform_6(%arg0: i32) -> (i32, i32) {
    %c0_i32 = arith.constant 0 : i32
    %c0_i32_0 = arith.constant 0 : i32
    %c0_i32_1 = arith.constant 0 : i32
    return %c0_i32, %c0_i32_0 : i32, i32
  }
  func.func @transform_7(%arg0: i32) -> (i32, i32, i32) {
    %c0_i32 = arith.constant 0 : i32
    %c0_i32_0 = arith.constant 0 : i32
    %c0_i32_1 = arith.constant 0 : i32
    %c0_i32_2 = arith.constant 0 : i32
    return %c0_i32, %c0_i32_0, %c0_i32_1 : i32, i32, i32
  }
  func.func @transform_8(%arg0: i32) -> (i32, i32) {
    %c0_i32 = arith.constant 0 : i32
    %c0_i32_0 = arith.constant 0 : i32
    %c0_i32_1 = arith.constant 0 : i32
    return %c0_i32, %c0_i32_0 : i32, i32
  }
  func.func @transform_9(%arg0: i32) -> (i32, i32) {
    %c0_i32 = arith.constant 0 : i32
    %c0_i32_0 = arith.constant 0 : i32
    %c0_i32_1 = arith.constant 0 : i32
    return %c0_i32, %c0_i32_0 : i32, i32
  }
  func.func @transform_10(%arg0: i32) -> (i32, i32) {
    %c0_i32 = arith.constant 0 : i32
    %c0_i32_0 = arith.constant 0 : i32
    %c0_i32_1 = arith.constant 0 : i32
    return %c0_i32, %c0_i32_0 : i32, i32
  }
  func.func @transform_11(%arg0: i32) -> (i32, i32, i32) {
    %c0_i32 = arith.constant 0 : i32
    %c0_i32_0 = arith.constant 0 : i32
    %c0_i32_1 = arith.constant 0 : i32
    return %arg0, %c0_i32, %c0_i32_0 : i32, i32, i32
  }
}

</mosaic_0001>

<bundles_post_ra>
// kernel: seq2seq_forward.15
= control target key start
LH: loop header
LB: loop body
LE: loop exit
PB: predicated region body
PF: predicated region fallthrough
CT: control target
= control target key end

     0   :  { %s219_s9 = smov 0   ;;  %s247_s0 = inlined_call_operand.vmem [shape: f32[2,8,32], index: 0, kind: input, shape index: {}]   ;;  %s248_s1 = inlined_call_operand.vmem [shape: f32[8,32], index: 1, kind: input, shape index: {}]   ;;  %s249_s2 = inlined_call_operand.vmem [shape: f32[2,8,32], index: 2, kind: output, shape index: {}]  }
   0x1 LB: > { %s198_s10 = sadd.s32 4294967295, %s221_s9   ;;  %p202_p0 = scmp.ge.s32.totalorder %s221_s9, 1  ;;  %s221_s9 = sphi %s219_s9, %s12_s9  }
   0x2   : > { %p111_p1 = scmp.lt.s32.totalorder %s221_s9, 3 }
   0x4   : > { %p112_p2 = pnand %p202_p0, %p111_p1 }
   0x5   : > { %p131_p3 = scmp.lt.s32.totalorder (!%p112_p2), %s198_s10, 1 }
   0x6   : > { %115 = sbr.rel (%p112_p2) target bundleno = 20 (0x14), region = 28 }
   0xb   : > { %s251_s10 = smov (!%p131_p3, %s198_s10), 1  ;;  %v141_v1 = vld [vmem:[%s248_s1] sm:$0xff]  ;;  %vm143_vm0 = vcmask 261120  }
   0xc   : > { %s203_s11 = sshll.u32 %s251_s10, 3 }
   0xd   : > { %s134_s14 = scalar_lea.vmem %s247_s0, %s203_s11  ;;  %s138_s19 = scalar_lea.vmem %s249_s2, %s203_s11 }
   0xe   : > { %v139_v0 = vld [vmem:[%s134_s14] sm:$0xff] }
   0xf   : > { %v140_v2 = vmul.f32 5.656854, %v139_v0 }
  0x11   : > { %v142_v3 = vadd.f32 %v141_v1, %v140_v2 }
  0x13   : > { %144 = vst.msk [vmem:[%s138_s19] sm:$0xff] %vm143_vm0, %v142_v3 }
  0x14 PF: > { %s12_s9 = sadd.s32 1, %s221_s9  }
  0x15   : > { %p9_p4 = scmp.ge.s32.totalorder %s12_s9, 4  }
  0x17   :  { %11 = sbr.rel (!%p9_p4) target bundleno = 1 (0x1), region = 58 }

// kernel: seq2seq_forward.18
= control target key start
LH: loop header
LB: loop body
LE: loop exit
PB: predicated region body
PF: predicated region fallthrough
CT: control target
= control target key end

     0   :  { %s570_s24 = smov 0   ;;  %s628_s0 = inlined_call_operand.vmem [shape: f32[16,32], index: 0, kind: input, shape index: {}]   ;;  %s629_s1 = inlined_call_operand.vmem [shape: bf16[32,64], index: 1, kind: input, shape index: {}]   ;;  %s630_s2 = inlined_call_operand.vmem [shape: f32[1,64], index: 2, kind: input, shape index: {}]   ;;  %s631_s3 = inlined_call_operand.vmem [shape: bf16[64,32], index: 3, kind: input, shape index: {}]   ;;  %s632_s4 = inlined_call_operand.vmem [shape: f32[1,32], index: 4, kind: input, shape index: {}]   ;;  %s633_s5 = inlined_call_operand.vmem [shape: f32[1,32], index: 5, kind: input, shape index: {}]   ;;  %s634_s6 = inlined_call_operand.vmem [shape: f32[1,32], index: 6, kind: input, shape index: {}]   ;;  %s635_s7 = inlined_call_operand.vmem [shape: f32[16,32], index: 7, kind: output, shape index: {}]  }
   0x1 LB: > { %s463_s25 = sadd.s32 4294967295, %s527_s24   ;;  %p467_p0 = scmp.ge.s32.totalorder %s527_s24, 1  ;;  %s527_s24 = sphi %s570_s24, %s17_s24  }
   0x2   : > { %p236_p1 = scmp.lt.s32.totalorder %s527_s24, 3 }
   0x4   : > { %p237_p2 = pnand %p467_p0, %p236_p1 }
   0x5   : > { %p266_p3 = scmp.lt.s32.totalorder (!%p237_p2), %s463_s25, 1 }
   0x6   : > { %240 = sbr.rel (%p237_p2) target bundleno = 550 (0x226), region = 48 }
   0xb   : > { %v499_v0 = vld [vmem:[%s629_s1 + $0x8] sm:$0xff]  ;;  %v503_v1 = vld [vmem:[%s631_s3 + $0x18] sm:$0xff]  ;;  %v498_v2 = vld [vmem:[%s629_s1] sm:$0xff]  ;;  %s637_s25 = smov (!%p266_p3, %s463_s25), 1  ;;  %vm297_vm0 = vcmask 261120   ;;  %vm352_vm1 = vcmask 523264  }
   0xc   : > { %307 = vmatpush.bf16.msra.mxu0 %v499_v0  ;;  %360 = vmatpush.bf16.msra.mxu1 %v503_v1  ;;  %v502_v3 = vld [vmem:[%s631_s3 + $0x10] sm:$0xff]  ;;  %s468_s11 = sshll.u32 %s637_s25, 3  ;;  %v501_v6 = vld [vmem:[%s631_s3 + $0x8] sm:$0xff]  ;;  %v500_v7 = vld [vmem:[%s631_s3] sm:$0xff]  ;;  %v529_v20 = vmov 32.0  }
   0xd   : > { %s269_s14 = scalar_lea.vmem %s628_s0, %s468_s11  ;;  %v513_v8 = vld [vmem:[%s630_s2] ss:$0 sm:$0xff]  ;;  %517 = vrcp.f32 %v529_v20  ;;  %s273_s8 = scalar_lea.vmem %s635_s7, %s468_s11 }
   0xe   : > { %v275_v4 = vld [vmem:[%s269_s14] sm:$0xff] }
   0xf   : > { %v276_v5 = vpack.c.bf16 %v275_v4, %v275_v4  ;;  %v514_v14 = vld [vmem:[%s632_s4] ss:$0 sm:$0xff] }
  0x10   : > { %308 = vmatpush.bf16.msra.mxu0 %v498_v2  ;;  %361 = vmatpush.bf16.msra.mxu1 %v502_v3  ;;  %v515_v41 = vld [vmem:[%s633_s5] ss:$0 sm:$0xff] }
  0x11   : > { %v516_v43 = vld [vmem:[%s634_s6] ss:$0 sm:$0xff] }
  0x13   : > { %478 = vmatmul.msk.bf16.vlgmr.msra.gmra.mxu0 %vm297_vm0, %v276_v5  ;;  %v518_v21 = vpop.eup %517 }
  0x14   : > { %362 = vmatpush.bf16.msra.mxu1 %v501_v6  ;;  %v374_v22 = vmul.f32 32.0, %v518_v21  ;;  %vm378_vm2 = vweird.f32 %v518_v21 }
  0x16   : > { %v375_v23 = vsub.f32 1.0, %v374_v22 }
  0x18   : > { %363 = vmatpush.bf16.msra.mxu1 %v500_v7  ;;  %v376_v24 = vmul.f32 %v518_v21, %v375_v23 }
  0x1a   : > { %v377_v25 = vadd.f32 %v518_v21, %v376_v24 }
  0x1c   : > { %v379_v26 = vsel %vm378_vm2, %v518_v21, %v377_v25 }
  0x90   : > { %v310_v9 = vpop.f32.mrf.mxu0 }
  0x91   : > { %v311_v10 = vadd.f32 %v513_v8, %v310_v9 }
  0x93   : > { %v314_v11 = vmax.f32 %v311_v10, 0.0 }
  0x95   : > { %v315_v12 = vpack.c.bf16 %v314_v11, %v314_v11 }
  0x97   : > { %495 = vmatmul.msk.bf16.vlgmr.msra.gmra.mxu1 %vm352_vm1, %v315_v12 }
  0x98   : > { %v312_v13 = vpop.f32.mrf.mxu0 }
 0x114   : > { %v365_v15 = vpop.f32.mrf.mxu1 }
 0x115   : > { %v366_v16 = vadd.f32 %v514_v14, %v365_v15 }
 0x117   : > { %v369_v17 = vadd.f32 %v366_v16, %v275_v4 }
 0x119   : > { %v370_v18 = vsel %vm297_vm0, %v369_v17, 0.0 }
 0x11a   : > { %371 = vadd.xlane.f32.xlu0 %v370_v18 }
 0x11c   : > { %v367_v19 = vpop.f32.mrf.mxu1 }
 0x18d   : > { %v372_v27 = vpop.xlane.xlu0 %371 }
 0x18e   : > { %v380_v28 = vmul.f32 %v379_v26, %v372_v27 }
 0x190   : > { %v381_v29 = vsub.f32 %v369_v17, %v380_v28 }
 0x192   : > { %v382_v30 = vmul.f32 %v381_v29, %v381_v29 }
 0x194   : > { %v383_v31 = vsel %vm297_vm0, %v382_v30, 0.0 }
 0x195   : > { %384 = vadd.xlane.f32.xlu0 %v383_v31 }
 0x208   : > { %v385_v32 = vpop.xlane.xlu0 %384 }
 0x209   : > { %v386_v33 = vmul.f32 %v385_v32, %v379_v26 }
 0x20b   : > { %v387_v34 = vadd.f32 1e-05, %v386_v33 }
 0x20d   : > { %519 = vrsqrt.f32 %v387_v34  ;;  %vm394_vm4 = vweird.f32 %v387_v34 }
 0x213   : > { %v520_v35 = vpop.eup %519 }
 0x214   : > { %v389_v36 = vmul.f32 %v520_v35, %v387_v34  ;;  %vm395_vm3 = vweird.f32 %v520_v35 }
 0x215   : > { %vm396_vm5 = vmor %vm394_vm4, %vm395_vm3 }
 0x216   : > { %v390_v37 = vmul.f32 %v520_v35, %v389_v36 }
 0x218   : > { %v391_v38 = vmul.f32 0.5, %v390_v37 }
 0x21a   : > { %v392_v39 = vsub.f32 1.5, %v391_v38 }
 0x21c   : > { %v393_v40 = vmul.f32 %v520_v35, %v392_v39 }
 0x21e   : > { %v397_v42 = vsel %vm396_vm5, %v520_v35, %v393_v40 }
 0x21f   : > { %v398_v44 = vmul.f32 %v397_v42, %v381_v29 }
 0x221   : > { %v403_v45 = vmul.f32 %v515_v41, %v398_v44 }
 0x223   : > { %v408_v46 = vadd.f32 %v516_v43, %v403_v45 }
 0x225   : > { %409 = vst.msk [vmem:[%s273_s8] sm:$0xff] %vm297_vm0, %v408_v46 }
 0x226 PF: > { %s17_s24 = sadd.s32 1, %s527_s24  }
 0x227   : > { %p14_p4 = scmp.ge.s32.totalorder %s17_s24, 4  }
 0x229   :  { %16 = sbr.rel (!%p14_p4) target bundleno = 1 (0x1), region = 78 }

// kernel: seq2seq_forward.21
= control target key start
LH: loop header
LB: loop body
LE: loop exit
PB: predicated region body
PF: predicated region fallthrough
CT: control target
= control target key end

     0   :  { %s314_s12 = smov 0   ;;  %s347_s0 = inlined_call_operand.vmem [shape: f32[16,32], index: 0, kind: input, shape index: {}]   ;;  %s348_s1 = inlined_call_operand.vmem [shape: f32[1,32], index: 1, kind: input, shape index: {}]   ;;  %s349_s2 = inlined_call_operand.vmem [shape: f32[1,32], index: 2, kind: input, shape index: {}]   ;;  %s350_s3 = inlined_call_operand.vmem [shape: f32[16,32], index: 3, kind: output, shape index: {}]  }
   0x1 LB: > { %s261_s13 = sadd.s32 4294967295, %s291_s12   ;;  %p265_p0 = scmp.ge.s32.totalorder %s291_s12, 1  ;;  %s291_s12 = sphi %s314_s12, %s13_s12  }
   0x2   : > { %p136_p1 = scmp.lt.s32.totalorder %s291_s12, 3 }
   0x4   : > { %p137_p2 = pnand %p265_p0, %p136_p1 }
   0x5   : > { %p158_p3 = scmp.lt.s32.totalorder (!%p137_p2), %s261_s13, 1 }
   0x6   : > { %140 = sbr.rel (%p137_p2) target bundleno = 284 (0x11c), region = 32 }
   0xb   : > { %s352_s13 = smov (!%p158_p3, %s261_s13), 1  ;;  %vm167_vm0 = vcmask 261120   ;;  %v293_v2 = vmov 32.0   ;;  %v279_v23 = vld [vmem:[%s348_s1] ss:$0 sm:$0xff] }
   0xc   : > { %s266_s14 = sshll.u32 %s352_s13, 3  ;;  %281 = vrcp.f32 %v293_v2  ;;  %v280_v25 = vld [vmem:[%s349_s2] ss:$0 sm:$0xff] }
   0xd   : > { %s161_s17 = scalar_lea.vmem %s347_s0, %s266_s14  ;;  %s165_s24 = scalar_lea.vmem %s350_s3, %s266_s14 }
   0xe   : > { %v166_v0 = vld [vmem:[%s161_s17] sm:$0xff] }
   0xf   : > { %v168_v1 = vsel %vm167_vm0, %v166_v0, 0.0 }
  0x10   : > { %169 = vadd.xlane.f32.xlu0 %v168_v1 }
  0x12   : > { %v282_v3 = vpop.eup %281 }
  0x13   : > { %v172_v4 = vmul.f32 32.0, %v282_v3  ;;  %vm176_vm1 = vweird.f32 %v282_v3 }
  0x15   : > { %v173_v5 = vsub.f32 1.0, %v172_v4 }
  0x17   : > { %v174_v6 = vmul.f32 %v282_v3, %v173_v5 }
  0x19   : > { %v175_v7 = vadd.f32 %v282_v3, %v174_v6 }
  0x1b   : > { %v177_v8 = vsel %vm176_vm1, %v282_v3, %v175_v7 }
  0x83   : > { %v170_v9 = vpop.xlane.xlu0 %169 }
  0x84   : > { %v178_v10 = vmul.f32 %v177_v8, %v170_v9 }
  0x86   : > { %v179_v11 = vsub.f32 %v166_v0, %v178_v10 }
  0x88   : > { %v180_v12 = vmul.f32 %v179_v11, %v179_v11 }
  0x8a   : > { %v181_v13 = vsel %vm167_vm0, %v180_v12, 0.0 }
  0x8b   : > { %182 = vadd.xlane.f32.xlu0 %v181_v13 }
  0xfe   : > { %v183_v14 = vpop.xlane.xlu0 %182 }
  0xff   : > { %v184_v15 = vmul.f32 %v183_v14, %v177_v8 }
 0x101   : > { %v185_v16 = vadd.f32 1e-05, %v184_v15 }
 0x103   : > { %283 = vrsqrt.f32 %v185_v16  ;;  %vm192_vm3 = vweird.f32 %v185_v16 }
 0x109   : > { %v284_v17 = vpop.eup %283 }
 0x10a   : > { %v187_v18 = vmul.f32 %v284_v17, %v185_v16  ;;  %vm193_vm2 = vweird.f32 %v284_v17 }
 0x10b   : > { %vm194_vm4 = vmor %vm192_vm3, %vm193_vm2 }
 0x10c   : > { %v188_v19 = vmul.f32 %v284_v17, %v187_v18 }
 0x10e   : > { %v189_v20 = vmul.f32 0.5, %v188_v19 }
 0x110   : > { %v190_v21 = vsub.f32 1.5, %v189_v20 }
 0x112   : > { %v191_v22 = vmul.f32 %v284_v17, %v190_v21 }
 0x114   : > { %v195_v24 = vsel %vm194_vm4, %v284_v17, %v191_v22 }
 0x115   : > { %v196_v26 = vmul.f32 %v195_v24, %v179_v11 }
 0x117   : > { %v201_v27 = vmul.f32 %v279_v23, %v196_v26 }
 0x119   : > { %v206_v28 = vadd.f32 %v280_v25, %v201_v27 }
 0x11b   : > { %207 = vst.msk [vmem:[%s165_s24] sm:$0xff] %vm167_vm0, %v206_v28 }
 0x11c PF: > { %s13_s12 = sadd.s32 1, %s291_s12  }
 0x11d   : > { %p10_p4 = scmp.ge.s32.totalorder %s13_s12, 4  }
 0x11f   :  { %12 = sbr.rel (!%p10_p4) target bundleno = 1 (0x1), region = 62 }

// kernel: seq2seq_forward.17
= control target key start
LH: loop header
LB: loop body
LE: loop exit
PB: predicated region body
PF: predicated region fallthrough
CT: control target
= control target key end

     0   :  { %s1110_s17 = smov 0   ;;  %s1234_s0 = inlined_call_operand.vmem [shape: f32[2,8,32], index: 0, kind: input, shape index: {}, may-alias: {0,1}]   ;;  %s1235_s1 = inlined_call_operand.vmem [shape: f32[2,8,32], index: 1, kind: input, shape index: {}, may-alias: {0,1}]   ;;  %s1236_s2 = inlined_call_operand.vmem [shape: f32[2,8,8], index: 2, kind: input, shape index: {}]   ;;  %s1237_s3 = inlined_call_operand.vmem [shape: bf16[32,32], index: 3, kind: input, shape index: {}]   ;;  %s1238_s4 = inlined_call_operand.vmem [shape: bf16[32,64], index: 4, kind: input, shape index: {}]   ;;  %s1239_s5 = inlined_call_operand.vmem [shape: f32[1,32], index: 5, kind: input, shape index: {}]   ;;  %s1240_s6 = inlined_call_operand.vmem [shape: f32[1,64], index: 6, kind: input, shape index: {}]   ;;  %s1241_s7 = inlined_call_operand.vmem [shape: bf16[4,8,32], index: 7, kind: input, shape index: {}]   ;;  %s1242_s8 = inlined_call_operand.vmem [shape: f32[1,32], index: 8, kind: input, shape index: {}]   ;;  %s1243_s9 = inlined_call_operand.vmem [shape: f32[1,32], index: 9, kind: input, shape index: {}]   ;;  %s1244_s10 = inlined_call_operand.vmem [shape: f32[1,32], index: 10, kind: input, shape index: {}]   ;;  %s1245_s11 = inlined_call_operand.vmem [shape: f32[2,8,32], index: 11, kind: output, shape index: {}]  }
   0x1 LB: > { %s945_s18 = sadd.s32 4294967295, %s1040_s17   ;;  %p949_p0 = scmp.ge.s32.totalorder %s1040_s17, 1  ;;  %s1040_s17 = sphi %s1110_s17, %s21_s17  }
   0x2   : > { %p354_p1 = scmp.lt.s32.totalorder %s1040_s17, 3 }
   0x4   : > { %p355_p2 = pnand %p949_p0, %p354_p1 }
   0x5   : > { %p400_p3 = scmp.lt.s32.totalorder (!%p355_p2), %s945_s18, 1  ;;  %s1042_s20 = smov (!%p355_p2), 120  }
   0x6   : > { %358 = sbr.rel (%p355_p2) target bundleno = 1628 (0x65c), region = 64  ;;  %s1043_s21 = smov (!%p355_p2), 96  }
   0x7   : > { %s1044_s22 = smov (!%p355_p2), 104   ;;  %s1045_s23 = smov (!%p355_p2), 112  }
   0x8   : > { %s1047_s12 = smov (!%p355_p2), 80   ;;  %s1048_s13 = smov (!%p355_p2), 72  }
   0xb   : > { %v990_v0 = vld [vmem:[%s1237_s3 + $0x8] sm:$0xff]  ;;  %v989_v2 = vld [vmem:[%s1237_s3] sm:$0xff]  ;;  %s1247_s18 = smov (!%p400_p3, %s945_s18), 1  ;;  %vm441_vm0 = vcmask 261120   ;;  %vm497_vm1 = vcmask 64512   ;;  %vm539_vm2 = vcmask 1043456  }
   0xc   : > { %v992_v1 = vld [vmem:[%s1238_s4 + $0x8] sm:$0xff]  ;;  %451 = vmatpush.bf16.msra.mxu0 %v990_v0  ;;  %v991_v3 = vld [vmem:[%s1238_s4] sm:$0xff]  ;;  %s1130_s27 = sshll.u32 %s1247_s18, 3 }
   0xd   : > { %488 = vmatpush.bf16.msra.mxu1 %v992_v1  ;;  %s403_s30 = scalar_lea.vmem %s1234_s0, %s1130_s27  ;;  %s407_s14 = scalar_lea.vmem %s1235_s1, %s1130_s27  ;;  %v1009_v8 = vld [vmem:[%s1239_s5] ss:$0 sm:$0xff] }
   0xe   : > { %v1136_v4 = vld [vmem:[%s403_s30] sm:$0xff]  ;;  %s411_s29 = scalar_lea.vmem %s1236_s2, %s1130_s27  ;;  %s1046_s30 = smov 88  }
   0xf   : > { %v420_v5 = vpack.c.bf16 %v1136_v4, %v1136_v4  ;;  %v418_v6 = vld [vmem:[%s407_s14] sm:$0xff] }
  0x10   : > { %452 = vmatpush.bf16.msra.mxu0 %v989_v2  ;;  %v458_v7 = vpack.c.bf16 %v418_v6, %v418_v6  ;;  %v1010_v9 = vld [vmem:[%s1240_s6] ss:$0 sm:$0xff] }
  0x11   : > { %489 = vmatpush.bf16.msra.mxu1 %v991_v3  ;;  %v557_v23 = vld [vmem:[%s1241_s7] sm:$0xf] }
  0x12   : > { %v645_v24 = vsel %vm539_vm2, %v557_v23, 0  ;;  %v419_v33 = vld [vmem:[%s411_s29] sm:$0xff] }
  0x13   : > { %962 = vmatmul.msk.bf16.vlgmr.msra.gmra.mxu0 %vm441_vm0, %v420_v5 }
  0x14   : > { %971 = vmatmul.msk.bf16.vlgmr.msra.gmra.mxu1 %vm441_vm0, %v458_v7 }
  0x90   : > { %v454_v10 = vpop.f32.mrf.mxu0 }
  0x91   : > { %v455_v11 = vadd.f32 %v1009_v8, %v454_v10  ;;  %v491_v12 = vpop.f32.mrf.mxu1 }
  0x92   : > { %v492_v13 = vadd.f32 %v1010_v9, %v491_v12 }
  0x93   : > { %v495_v14 = vpack.c.bf16 %v455_v11, %v455_v11 }
  0x94   : > { %v496_v15 = vpack.c.bf16 %v492_v13, %v492_v13 }
  0x95   : > { %v559_v16 = vunpack.c.l.b16 %v495_v14 }
  0x96   : > { %v532_v17 = vunpack.c.l.b16 %v496_v15  ;;  %v502_v18 = vsel %vm497_vm1, %v496_v15, 0 }
  0x97   : > { %v560_v19 = vpack.c.b16 %v559_v16, %v559_v16  ;;  %511 = vmatpush.bf16.xpose.msra.mxu2 %v502_v18 }
  0x98   : > { %v1153_v20 = vpack.c.b16 %v532_v17, %v532_v17  ;;  %v456_v21 = vpop.f32.mrf.mxu0 }
  0x99   : > { %v493_v22 = vpop.f32.mrf.mxu1  ;;  %561 = vrot.lane.b32.xlu2 %v560_v19, %s1042_s20 }
  0x9a   : > { %534 = vrot.lane.b32.xlu1 %v1153_v20, %s1043_s21 }
  0x9e   : > { %972 = vmatmul.msk.bf16.vlgmr.msra.gmra.mxu2 %vm497_vm1, %v495_v14 }
  0x9f   : > { %654 = vmatpush.bf16.msrb.mxu2 %v645_v24 }
  0xa1   : > { %743 = vrot.lane.b32.xlu2 %v1153_v20, %s1044_s22 }
  0xa2   : > { %563 = vrot.lane.b32.xlu1 %v1153_v20, %s1042_s20 }
  0xa9   : > { %660 = vrot.lane.b32.xlu2 %v560_v19, %s1045_s23 }
  0xaa   : > { %741 = vrot.lane.b32.xlu1 %v560_v19, %s1044_s22 }
  0xf3   : > { %v562_v25 = vpop.permute.xlu2 %561 }
  0xfb   : > { %v744_v26 = vpop.permute.xlu2 %743 }
  0xfc   : > { %v749_v27 = vsel %vm497_vm1, %v744_v26, 0 }
  0xfd   : > { %758 = vmatpush.bf16.xpose.msra.mxu2 %v749_v27 }
 0x103   : > { %v661_v49 = vpop.permute.xlu2 %660 }
 0x10c   : > { %v535_v28 = vpop.permute.xlu1 %534 }
 0x10d   : > { %v541_v29 = vsel %vm539_vm2, %v535_v28, 0 }
 0x10e   : > { %550 = vmatpush.bf16.msra.mxu3 %v541_v29 }
 0x114   : > { %v564_v30 = vpop.permute.xlu1 %563 }
 0x115   : > { %v569_v31 = vsel %vm497_vm1, %v564_v30, 0 }
 0x116   : > { %578 = vmatpush.bf16.xpose.msrb.mxu3 %v569_v31 }
 0x11c   : > { %v742_v55 = vpop.permute.xlu1 %741 }
 0x121   : > { %v513_v32 = vpop.f32.mrf.mxu2 }
 0x122   : > { %v517_v34 = vmul.f32 0.35355338, %v513_v32 }
 0x124   : > { %v518_v35 = vadd.f32 %v517_v34, %v419_v33 }
 0x126   : > { %v519_v36 = vsel %vm497_vm1, %v518_v35, -inf }
 0x127   : > { %520 = vmax.xlane.f32.xlu0 %v519_v36  ;;  %v976_v36 = vld [vmem:[%s1241_s7 + $0x4] sm:$0xf] }
 0x129   : > { %v515_v37 = vpop.f32.mrf.mxu2 }
 0x12a   : > { %v626_v37 = vsel %vm539_vm2, %v976_v36, 0 }
 0x12b   : > { %635 = vmatpush.bf16.msrb.mxu1 %v626_v37 }
 0x19a   : > { %v521_v38 = vpop.xlane.xlu0 %520 }
 0x19b   : > { %v522_v39 = vsub.f32 %v518_v35, %v521_v38  ;;  %v981_v38 = vld [vmem:[%s1241_s7 + $0x8] sm:$0xf] }
 0x19d   : > { %v523_v40 = vmul.f32 1.442695, %v522_v39 }
 0x19f   : > { %1014 = vpow2.f32 %v523_v40  ;;  %v725_v40 = vsel %vm539_vm2, %v981_v38, 0 }
 0x1a0   : > { %734 = vmatpush.bf16.msra.mxu1 %v725_v40 }
 0x1a5   : > { %v1015_v41 = vpop.eup %1014 }
 0x1a6   : > { %v525_v42 = vsel %vm497_vm1, %v1015_v41, 0.0 }
 0x1a7   : > { %526 = vadd.xlane.f32.xlu0 %v525_v42 }
 0x1bb   : > { %662 = vrot.lane.b32.xlu0 %v1153_v20, %s1045_s23 }
 0x21a   : > { %v527_v43 = vpop.xlane.xlu0 %526 }
 0x21b   : > { %1016 = vrcp.f32 %v527_v43 }
 0x221   : > { %v1017_v44 = vpop.eup %1016 }
 0x222   : > { %v529_v45 = vmul.f32 %v1017_v44, %v1015_v41 }
 0x224   : > { %v530_v46 = vpack.c.bf16 %v529_v45, %v529_v45 }
 0x226   : > { %973 = vmatmul.msk.bf16.vlgmr.msra.gmra.mxu3 %vm497_vm1, %v530_v46 }
 0x22d   : > { %v663_v47 = vpop.permute.xlu0 %662 }
 0x22e   : > { %v668_v48 = vsel %vm497_vm1, %v663_v47, 0 }
 0x22f   : > { %677 = vmatpush.bf16.xpose.msra.mxu3 %v668_v48 }
 0x236   : > { %974 = vmatmul.msk.bf16.vlgmr.msrb.gmra.mxu3 %vm497_vm1, %v562_v25 }
 0x246   : > { %979 = vmatmul.msk.bf16.vlgmr.msra.gmra.mxu3 %vm497_vm1, %v661_v49 }
 0x2a9   : > { %v552_v50 = vpop.f32.mrf.mxu3 }
 0x2aa   : > { %v556_v51 = vpack.c.bf16 %v552_v50, %v552_v50 }
 0x2ac   : > { %978 = vmatmul.msk.bf16.vlgmr.msrb.gmra.mxu2 %vm497_vm1, %v556_v51  ;;  %v985_v51 = vld [vmem:[%s1241_s7 + $0xc] sm:$0xf] }
 0x2b1   : > { %v554_v52 = vpop.f32.mrf.mxu3 }
 0x2b2   : > { %v806_v52 = vsel %vm539_vm2, %v985_v51, 0 }
 0x2b9   : > { %v580_v53 = vpop.f32.mrf.mxu3 }
 0x2ba   : > { %v584_v54 = vmul.f32 0.35355338, %v580_v53 }
 0x2bc   : > { %983 = vmatmul.msk.bf16.vlgmr.msra.gmra.mxu2 %vm497_vm1, %v742_v55  ;;  %v585_v56 = vadd.f32 %v584_v54, %v419_v33 }
 0x2be   : > { %v586_v57 = vsel %vm497_vm1, %v585_v56, -inf }
 0x2bf   : > { %587 = vmax.xlane.f32.xlu1 %v586_v57 }
 0x2c1   : > { %v582_v58 = vpop.f32.mrf.mxu3 }
 0x2c9   : > { %v679_v59 = vpop.f32.mrf.mxu3 }
 0x2ca   : > { %v683_v60 = vmul.f32 0.35355338, %v679_v59 }
 0x2cc   : > { %v684_v61 = vadd.f32 %v683_v60, %v419_v33 }
 0x2ce   : > { %v685_v62 = vsel %vm497_vm1, %v684_v61, -inf }
 0x2cf   : > { %686 = vmax.xlane.f32.xlu0 %v685_v62  ;;  %v1011_v62 = vld [vmem:[%s1242_s8] ss:$0 sm:$0xff] }
 0x2d1   : > { %v681_v63 = vpop.f32.mrf.mxu3 }
 0x2d8   : > { %598 = vrot.lane.b32.xlu1 %v1153_v20, %s1046_s30  ;;  %s415_s30 = scalar_lea.vmem %s1245_s11, %s1130_s27 }
 0x32f   : > { %v1184_v0 = vpop.f32.mrf.mxu2 }
 0x332   : > { %v588_v2 = vpop.xlane.xlu1 %587 }
 0x333   : > { %v589_v3 = vsub.f32 %v585_v56, %v588_v2 }
 0x335   : > { %v590_v5 = vmul.f32 1.442695, %v589_v3 }
 0x337   : > { %v658_v1 = vpop.f32.mrf.mxu2  ;;  %1018 = vpow2.f32 %v590_v5 }
 0x33d   : > { %v1019_v14 = vpop.eup %1018 }
 0x33e   : > { %v592_v17 = vsel %vm497_vm1, %v1019_v14, 0.0 }
 0x33f   : > { %v760_v6 = vpop.f32.mrf.mxu2 }
 0x340   : > { %v764_v7 = vmul.f32 0.35355338, %v760_v6 }
 0x342   : > { %v687_v8 = vpop.xlane.xlu0 %686  ;;  %v765_v9 = vadd.f32 %v764_v7, %v419_v33  ;;  %v1049_v7 = vmov 32.0  }
 0x343   : > { %v688_v10 = vsub.f32 %v684_v61, %v687_v8 }
 0x344   : > { %v766_v11 = vsel %vm497_vm1, %v765_v9, -inf }
 0x345   : > { %v689_v12 = vmul.f32 1.442695, %v688_v10  ;;  %767 = vmax.xlane.f32.xlu2 %v766_v11 }
 0x347   : > { %1020 = vpow2.f32 %v689_v12  ;;  %v762_v13 = vpop.f32.mrf.mxu2 }
 0x34a   : > { %v599_v15 = vpop.permute.xlu1 %598 }
 0x34b   : > { %v604_v16 = vsel %vm539_vm2, %v599_v15, 0 }
 0x34c   : > { %613 = vmatpush.bf16.msrb.mxu0 %v604_v16 }
 0x34d   : > { %v1021_v18 = vpop.eup %1020  ;;  %593 = vadd.xlane.f32.xlu2 %v592_v17 }
 0x34e   : > { %v691_v19 = vsel %vm497_vm1, %v1021_v18, 0.0 }
 0x34f   : > { %692 = vadd.xlane.f32.xlu0 %v691_v19 }
 0x363   : > { %697 = vrot.lane.b32.xlu0 %v1153_v20, %s1047_s12 }
 0x3b8   : > { %v768_v21 = vpop.xlane.xlu2 %767 }
 0x3b9   : > { %v769_v22 = vsub.f32 %v765_v9, %v768_v21 }
 0x3bb   : > { %v770_v23 = vmul.f32 1.442695, %v769_v22 }
 0x3bd   : > { %1022 = vpow2.f32 %v770_v23 }
 0x3c0   : > { %v594_v24 = vpop.xlane.xlu2 %593 }
 0x3c1   : > { %1024 = vrcp.f32 %v594_v24 }
 0x3c2   : > { %v693_v29 = vpop.xlane.xlu0 %692 }
 0x3c3   : > { %v1023_v25 = vpop.eup %1022  ;;  %1026 = vrcp.f32 %v693_v29  ;;  %v1013_v29 = vld [vmem:[%s1244_s10] ss:$0 sm:$0xff] }
 0x3c4   : > { %v772_v26 = vsel %vm497_vm1, %v1023_v25, 0.0 }
 0x3c5   : > { %773 = vadd.xlane.f32.xlu2 %v772_v26 }
 0x3c7   : > { %v1025_v27 = vpop.eup %1024 }
 0x3c8   : > { %v596_v28 = vmul.f32 %v1025_v27, %v1019_v14  ;;  %v1012_v27 = vld [vmem:[%s1243_s9] ss:$0 sm:$0xff] }
 0x3c9   : > { %v1027_v31 = vpop.eup %1026 }
 0x3ca   : > { %v597_v30 = vpack.c.bf16 %v596_v28, %v596_v28  ;;  %v695_v33 = vmul.f32 %v1027_v31, %v1021_v18 }
 0x3cc   : > { %975 = vmatmul.msk.bf16.vlgmr.msrb.gmra.mxu0 %vm497_vm1, %v597_v30  ;;  %v696_v35 = vpack.c.bf16 %v695_v33, %v695_v33 }
 0x3d5   : > { %v698_v32 = vpop.permute.xlu0 %697 }
 0x3d6   : > { %v703_v34 = vsel %vm539_vm2, %v698_v32, 0 }
 0x3d7   : > { %712 = vmatpush.bf16.msra.mxu0 %v703_v34 }
 0x3db   : > { %815 = vmatpush.bf16.msrb.mxu0 %v806_v52 }
 0x3dc   : > { %980 = vmatmul.msk.bf16.vlgmr.msra.gmra.mxu0 %vm497_vm1, %v696_v35 }
 0x3dd   : > { %778 = vrot.lane.b32.xlu2 %v1153_v20, %s1048_s13 }
 0x438   : > { %v774_v39 = vpop.xlane.xlu2 %773 }
 0x439   : > { %1028 = vrcp.f32 %v774_v39 }
 0x43a   : > { %1030 = vrcp.f32 %v1049_v7 }
 0x43f   : > { %v1029_v41 = vpop.eup %1028 }
 0x440   : > { %v776_v42 = vmul.f32 %v1029_v41, %v1023_v25  ;;  %v779_v43 = vpop.permute.xlu2 %778  ;;  %v1031_v8 = vpop.eup %1030 }
 0x441   : > { %v784_v20 = vsel %vm539_vm2, %v779_v43, 0  ;;  %vm836_vm3 = vweird.f32 %v1031_v8 }
 0x442   : > { %v777_v44 = vpack.c.bf16 %v776_v42, %v776_v42  ;;  %793 = vmatpush.bf16.msrb.mxu3 %v784_v20 }
 0x445   : > { %984 = vmatmul.msk.bf16.vlgmr.msrb.gmra.mxu3 %vm497_vm1, %v777_v44 }
 0x449   : > { %v615_v45 = vpop.f32.mrf.mxu0 }
 0x44a   : > { %v619_v46 = vpack.c.bf16 %v615_v45, %v615_v45 }
 0x44c   : > { %977 = vmatmul.msk.bf16.vlgmr.msrb.gmra.mxu1 %vm497_vm1, %v619_v46 }
 0x451   : > { %v617_v47 = vpop.f32.mrf.mxu0 }
 0x459   : > { %v714_v48 = vpop.f32.mrf.mxu0 }
 0x45a   : > { %v718_v49 = vpack.c.bf16 %v714_v48, %v714_v48 }
 0x45c   : > { %982 = vmatmul.msk.bf16.vlgmr.msra.gmra.mxu1 %vm497_vm1, %v718_v49 }
 0x461   : > { %v716_v50 = vpop.f32.mrf.mxu0 }
 0x4c8   : > { %v795_v53 = vpop.f32.mrf.mxu3 }
 0x4c9   : > { %v799_v54 = vpack.c.bf16 %v795_v53, %v795_v53  ;;  %v637_v55 = vpop.f32.mrf.mxu1 }
 0x4ca   : > { %v657_v58 = vadd.f32 %v1184_v0, %v637_v55  ;;  %v832_v0 = vmul.f32 32.0, %v1031_v8 }
 0x4cb   : > { %986 = vmatmul.msk.bf16.vlgmr.msrb.gmra.mxu0 %vm497_vm1, %v799_v54 }
 0x4cc   : > { %v833_v9 = vsub.f32 1.0, %v832_v0 }
 0x4ce   : > { %v834_v10 = vmul.f32 %v1031_v8, %v833_v9 }
 0x4d0   : > { %v797_v56 = vpop.f32.mrf.mxu3  ;;  %v835_v11 = vadd.f32 %v1031_v8, %v834_v10 }
 0x4d1   : > { %v639_v57 = vpop.f32.mrf.mxu1 }
 0x4d2   : > { %v837_v12 = vsel %vm836_vm3, %v1031_v8, %v835_v11 }
 0x4d9   : > { %v736_v59 = vpop.f32.mrf.mxu1 }
 0x4da   : > { %v740_v60 = vadd.f32 %v736_v59, %v657_v58 }
 0x4e1   : > { %v738_v61 = vpop.f32.mrf.mxu1 }
 0x548   : > { %v817_v63 = vpop.f32.mrf.mxu0 }
 0x549   : > { %v821_v1 = vadd.f32 %v817_v63, %v740_v60 }
 0x54b   : > { %v826_v2 = vadd.f32 %v1011_v62, %v821_v1 }
 0x54d   : > { %v827_v3 = vadd.f32 %v826_v2, %v1136_v4 }
 0x54f   : > { %v828_v5 = vsel %vm441_vm0, %v827_v3, 0.0 }
 0x550   : > { %829 = vadd.xlane.f32.xlu1 %v828_v5  ;;  %v819_v6 = vpop.f32.mrf.mxu0 }
 0x5c3   : > { %v830_v13 = vpop.xlane.xlu1 %829 }
 0x5c4   : > { %v838_v14 = vmul.f32 %v837_v12, %v830_v13 }
 0x5c6   : > { %v839_v15 = vsub.f32 %v827_v3, %v838_v14 }
 0x5c8   : > { %v840_v16 = vmul.f32 %v839_v15, %v839_v15 }
 0x5ca   : > { %v841_v17 = vsel %vm441_vm0, %v840_v16, 0.0 }
 0x5cb   : > { %842 = vadd.xlane.f32.xlu2 %v841_v17 }
 0x63e   : > { %v843_v4 = vpop.xlane.xlu2 %842 }
 0x63f   : > { %v844_v18 = vmul.f32 %v843_v4, %v837_v12 }
 0x641   : > { %v845_v19 = vadd.f32 1e-05, %v844_v18 }
 0x643   : > { %1032 = vrsqrt.f32 %v845_v19  ;;  %vm852_vm5 = vweird.f32 %v845_v19 }
 0x649   : > { %v1033_v21 = vpop.eup %1032 }
 0x64a   : > { %v847_v22 = vmul.f32 %v1033_v21, %v845_v19  ;;  %vm853_vm4 = vweird.f32 %v1033_v21 }
 0x64b   : > { %vm854_vm6 = vmor %vm852_vm5, %vm853_vm4 }
 0x64c   : > { %v848_v23 = vmul.f32 %v1033_v21, %v847_v22 }
 0x64e   : > { %v849_v24 = vmul.f32 0.5, %v848_v23 }
 0x650   : > { %v850_v25 = vsub.f32 1.5, %v849_v24 }
 0x652   : > { %v851_v26 = vmul.f32 %v1033_v21, %v850_v25 }
 0x654   : > { %v855_v28 = vsel %vm854_vm6, %v1033_v21, %v851_v26 }
 0x655   : > { %v856_v30 = vmul.f32 %v855_v28, %v839_v15 }
 0x657   : > { %v861_v31 = vmul.f32 %v1012_v27, %v856_v30 }
 0x659   : > { %v866_v32 = vadd.f32 %v1013_v29, %v861_v31 }
 0x65b   : > { %867 = vst.msk [vmem:[%s415_s30] sm:$0xff] %vm441_vm0, %v866_v32 }
 0x65c PF: > { %s21_s17 = sadd.s32 1, %s1040_s17  }
 0x65d   : > { %p18_p4 = scmp.ge.s32.totalorder %s21_s17, 4  }
 0x65f   :  { %20 = sbr.rel (!%p18_p4) target bundleno = 1 (0x1), region = 103 }

// kernel: seq2seq_forward.29
= control target key start
LH: loop header
LB: loop body
LE: loop exit
PB: predicated region body
PF: predicated region fallthrough
CT: control target
= control target key end

     0   :  { %s449_s12 = smov 0   ;;  %s451_s13 = smov 0   ;;  %s488_s0 = inlined_call_operand.vmem [shape: f32[16,32], index: 0, kind: input, shape index: {}]   ;;  %s489_s1 = inlined_call_operand.vmem [shape: bf16[32,60], index: 1, kind: input, shape index: {}]   ;;  %s490_s2 = inlined_call_operand.vmem [shape: f32[1,60], index: 2, kind: input, shape index: {}]   ;;  %s491_s3 = inlined_call_operand.vmem [shape: f32[16,60], index: 3, kind: output, shape index: {}]  }
   0x1   :  { %s453_s14 = smov 0  }
   0x2 LB: > { %s25_s15 = sadd.s32 1, %s423_s13  ;;  %p364_p0 = scmp.ge.s32.totalorder %s427_s14, 1  ;;  %s427_s14 = sphi %s453_s14, %s13_s14   ;;  %s423_s13 = sphi %s451_s13, %s493_s13   ;;  %s419_s12 = sphi %s449_s12, %s492_s12  }
   0x3   : > { %p27_p1 = scmp.ge.s32.totalorder %s25_s15, 2  ;;  %p167_p2 = scmp.lt.s32.totalorder %s427_s14, 3 }
   0x5   : > { %s495_s15 = smov (%p27_p1, %s25_s15), 0  ;;  %p168_p3 = pnand %p364_p0, %p167_p2 }
   0x6   : > { %p199_p4 = scmp.lt.s32.totalorder (!%p168_p3), %s419_s12, 1 }
   0x7   : > { %171 = sbr.rel (%p168_p3) target bundleno = 154 (0x9a), region = 32 }
   0xc   : > { %v379_v0 = vld [vmem:[%s489_s1 + $0x8] sm:$0xff]  ;;  %v378_v1 = vld [vmem:[%s489_s1] sm:$0xff]  ;;  %s497_s12 = smov (!%p199_p4, %s419_s12), 1  ;;  %vm240_vm0 = vcmask 261120   ;;  %vm257_vm1 = vcmask 490496  }
   0xd   : > { %250 = vmatpush.bf16.msra.mxu0 %v379_v0  ;;  %s365_s20 = sshll.u32 %s497_s12, 3  ;;  %v404_v4 = vld [vmem:[%s490_s2] ss:$0 sm:$0xff] }
   0xe   : > { %s202_s23 = scalar_lea.vmem %s488_s0, %s365_s20  ;;  %s216_s28 = scalar_lea.vmem %s491_s3, %s365_s20 }
   0xf   : > { %v218_v2 = vld [vmem:[%s202_s23] sm:$0xff] }
  0x10   : > { %v219_v3 = vpack.c.bf16 %v218_v2, %v218_v2 }
  0x11   : > { %251 = vmatpush.bf16.msra.mxu0 %v378_v1 }
  0x14   : > { %375 = vmatmul.msk.bf16.vlgmr.msra.gmra.mxu0 %vm240_vm0, %v219_v3 }
  0x91   : > { %v253_v5 = vpop.f32.mrf.mxu0 }
  0x92   : > { %v254_v6 = vadd.f32 %v404_v4, %v253_v5 }
  0x94   : > { %258 = vst.msk [vmem:[%s216_s28] sm:$0xff] %vm257_vm1, %v254_v6 }
  0x99   : > { %v255_v7 = vpop.f32.mrf.mxu0 }
  0x9a PF: > { %s13_s14 = sadd.s32 1, %s427_s14   ;;  %s492_s12 = smov %s423_s13 }
  0x9b   : > { %p10_p5 = scmp.ge.s32.totalorder %s13_s14, 4   ;;  %s493_s13 = smov %s495_s15 }
  0x9d   :  { %12 = sbr.rel (!%p10_p5) target bundleno = 2 (0x2), region = 68 }

// kernel: seq2seq_forward.26
= control target key start
LH: loop header
LB: loop body
LE: loop exit
PB: predicated region body
PF: predicated region fallthrough
CT: control target
= control target key end

     0   :  { %16 = vsyncpa [#allocation3], 0  ;;  %s1394_s0 = inlined_call_operand.vmem [shape: f32[2,8,32], index: 0, kind: input, shape index: {}]   ;;  %s1395_s1 = inlined_call_operand.vmem [shape: f32[2,8,32], index: 1, kind: input, shape index: {}]   ;;  %s1396_s2 = inlined_call_operand.vmem [shape: f32[2,8,8], index: 2, kind: input, shape index: {}]   ;;  %s1397_s3 = inlined_call_operand.vmem [shape: bf16[32,32], index: 3, kind: input, shape index: {}]   ;;  %s1398_s4 = inlined_call_operand.vmem [shape: bf16[32,64], index: 4, kind: input, shape index: {}]   ;;  %s1399_s5 = inlined_call_operand.vmem [shape: f32[1,32], index: 5, kind: input, shape index: {}]   ;;  %s1400_s6 = inlined_call_operand.vmem [shape: f32[1,64], index: 6, kind: input, shape index: {}]   ;;  %s1401_s7 = inlined_call_operand.vmem [shape: bf16[4,8,32], index: 7, kind: input, shape index: {}]   ;;  %s1402_s8 = inlined_call_operand.vmem [shape: f32[1,32], index: 8, kind: input, shape index: {}]   ;;  %s1403_s9 = inlined_call_operand.hbm [shape: f32[1,32], index: 9, kind: input, shape index: {}]   ;;  %s1404_s10 = inlined_call_operand.hbm [shape: f32[1,32], index: 10, kind: input, shape index: {}]   ;;  %s1405_s11 = inlined_call_operand.vmem [shape: f32[2,8,32], index: 11, kind: output, shape index: {}]  }
   0x1   :  { %17 = vsyncpa [#allocation5], 0  ;;  %s1257_s17 = smov 0  }
   0x2 LB: > { %s330_s20 = sshll.u32 %s1403_s9, 4  ;;  %s997_s21 = sadd.s32 4294967295, %s1185_s17   ;;  %s1185_s17 = sphi %s1257_s17, %s23_s17   ;;  %s331_s20 = int_to_ptr.hbm [resolvable:$true] %s330_s20 }
   0x3   : > { %p999_p0 = scmp.ge.s32.totalorder %s1185_s17, 1  ;;  %p300_p1 = scmp.lt.s32.totalorder %s1185_s17, 3 }
   0x4   : > { %p1064_p2 = scmp.eq.s32.totalorder %s997_s21, 0  ;;  %s1187_s23 = smov [#allocation2]  }
   0x5   : > { %p1268_p3 = pnand %p999_p0, %p300_p1  ;;  %s332_s24 = sshll.u32 %s1187_s23, 4  ;;  %s333_s24 = int_to_ptr.vmem [resolvable:$true] %s332_s24 }
   0x6   : > { %s342_s27 = sshll.u32 %s1404_s10, 4  ;;  %s1188_s28 = smov [#allocation4]   ;;  %s343_s27 = int_to_ptr.hbm [resolvable:$true] %s342_s27 }
   0x7   : > { %p1057_p4 = pneg %p1268_p3  ;;  %s344_s29 = sshll.u32 %s1188_s28, 4  ;;  %s345_s29 = int_to_ptr.vmem [resolvable:$true] %s344_s29 }
   0x8   : > { %378 = sbr.rel (%p1268_p3) target bundleno = 1633 (0x661), region = 64 }
   0x9   : > { %p1058_p5 = pnand %p1064_p2, %p1057_p4 }
   0xb   : > { %1060 = dma.hbm_to_vmem [thread:$0]  (!%p1058_p5), %s331_s20, 16, %s333_s24, [#allocation3]  }
   0xc   : > { %1063 = dma.hbm_to_vmem [thread:$0]  (!%p1058_p5), %s343_s27, 16, %s345_s29, [#allocation5]  }
   0xd   : > { %1176 = dma.done.wait (%p1064_p2), [#allocation3], 16  }
   0xe   : > { %1178 = vsyncadd (%p1064_p2), [#allocation3], 4294967280 }
   0xf   : > { %1180 = dma.done.wait (%p1064_p2), [#allocation5], 16  }
  0x10   : > { %1182 = vsyncadd (%p1064_p2), [#allocation5], 4294967280  ;;  %p430_p6 = scmp.lt.s32.totalorder %s997_s21, 1  ;;  %v1046_v0 = vld [vmem:[%s1397_s3 + $0x8] sm:$0xff]  ;;  %v1045_v2 = vld [vmem:[%s1397_s3] sm:$0xff]  ;;  %vm471_vm0 = vcmask 261120  }
  0x11   : > { %v1048_v1 = vld [vmem:[%s1398_s4 + $0x8] sm:$0xff]  ;;  %v1047_v3 = vld [vmem:[%s1398_s4] sm:$0xff]  ;;  %481 = vmatpush.bf16.msra.mxu0 %v1046_v0  ;;  %vm527_vm1 = vcmask 64512   ;;  %s1189_s13 = smov 96   ;;  %s1191_s15 = smov 104   ;;  %vm569_vm2 = vcmask 1043456  }
  0x12   : > { %s1408_s21 = smov (!%p430_p6, %s997_s21), 1  ;;  %518 = vmatpush.bf16.msra.mxu1 %v1048_v1  ;;  %v1086_v8 = vld [vmem:[%s1399_s5] ss:$0 sm:$0xff]  ;;  %s1192_s16 = smov 112  }
  0x13   : > { %s1284_s30 = sshll.u32 %s1408_s21, 3  ;;  %v1087_v9 = vld [vmem:[%s1400_s6] ss:$0 sm:$0xff]  ;;  %s1193_s21 = smov 88  }
  0x14   : > { %s433_s14 = scalar_lea.vmem %s1394_s0, %s1284_s30  ;;  %s437_s18 = scalar_lea.vmem %s1395_s1, %s1284_s30  ;;  %v587_v23 = vld [vmem:[%s1401_s7] sm:$0xf] }
  0x15   : > { %v1306_v4 = vld [vmem:[%s433_s14] sm:$0xff]  ;;  %482 = vmatpush.bf16.msra.mxu0 %v1045_v2  ;;  %s1190_s14 = smov 120   ;;  %v675_v24 = vsel %vm569_vm2, %v587_v23, 0  ;;  %s441_s23 = scalar_lea.vmem %s1396_s2, %s1284_s30 }
  0x16   : > { %v448_v5 = vld [vmem:[%s437_s18] sm:$0xff]  ;;  %v450_v6 = vpack.c.bf16 %v1306_v4, %v1306_v4  ;;  %519 = vmatpush.bf16.msra.mxu1 %v1047_v3  ;;  %s1194_s24 = smov 80   ;;  %s1195_s25 = smov 72  }
  0x17   : > { %v488_v7 = vpack.c.bf16 %v448_v5, %v448_v5  ;;  %v449_v33 = vld [vmem:[%s441_s23] sm:$0xff]  ;;  %s445_s19 = scalar_lea.vmem %s1405_s11, %s1284_s30 }
  0x18   : > { %1018 = vmatmul.msk.bf16.vlgmr.msra.gmra.mxu0 %vm471_vm0, %v450_v6 }
  0x19   : > { %1027 = vmatmul.msk.bf16.vlgmr.msra.gmra.mxu1 %vm471_vm0, %v488_v7 }
  0x95   : > { %v484_v10 = vpop.f32.mrf.mxu0 }
  0x96   : > { %v521_v11 = vpop.f32.mrf.mxu1  ;;  %v485_v12 = vadd.f32 %v1086_v8, %v484_v10 }
  0x97   : > { %v522_v13 = vadd.f32 %v1087_v9, %v521_v11 }
  0x98   : > { %v525_v14 = vpack.c.bf16 %v485_v12, %v485_v12 }
  0x99   : > { %v526_v15 = vpack.c.bf16 %v522_v13, %v522_v13 }
  0x9a   : > { %v589_v16 = vunpack.c.l.b16 %v525_v14 }
  0x9b   : > { %v562_v17 = vunpack.c.l.b16 %v526_v15  ;;  %v532_v18 = vsel %vm527_vm1, %v526_v15, 0 }
  0x9c   : > { %541 = vmatpush.bf16.xpose.msra.mxu2 %v532_v18  ;;  %v590_v19 = vpack.c.b16 %v589_v16, %v589_v16 }
  0x9d   : > { %v1319_v20 = vpack.c.b16 %v562_v17, %v562_v17  ;;  %v486_v21 = vpop.f32.mrf.mxu0 }
  0x9e   : > { %v523_v22 = vpop.f32.mrf.mxu1  ;;  %591 = vrot.lane.b32.xlu2 %v590_v19, %s1190_s14 }
  0x9f   : > { %564 = vrot.lane.b32.xlu1 %v1319_v20, %s1189_s13 }
  0xa3   : > { %1028 = vmatmul.msk.bf16.vlgmr.msra.gmra.mxu2 %vm527_vm1, %v525_v14 }
  0xa4   : > { %684 = vmatpush.bf16.msrb.mxu2 %v675_v24 }
  0xa6   : > { %773 = vrot.lane.b32.xlu2 %v1319_v20, %s1191_s15 }
  0xa7   : > { %593 = vrot.lane.b32.xlu1 %v1319_v20, %s1190_s14 }
  0xae   : > { %690 = vrot.lane.b32.xlu2 %v590_v19, %s1192_s16 }
  0xaf   : > { %771 = vrot.lane.b32.xlu1 %v590_v19, %s1191_s15 }
  0xf8   : > { %v592_v25 = vpop.permute.xlu2 %591 }
 0x100   : > { %v774_v26 = vpop.permute.xlu2 %773 }
 0x101   : > { %v779_v27 = vsel %vm527_vm1, %v774_v26, 0 }
 0x102   : > { %788 = vmatpush.bf16.xpose.msra.mxu2 %v779_v27 }
 0x108   : > { %v691_v49 = vpop.permute.xlu2 %690 }
 0x111   : > { %v565_v28 = vpop.permute.xlu1 %564 }
 0x112   : > { %v571_v29 = vsel %vm569_vm2, %v565_v28, 0 }
 0x113   : > { %580 = vmatpush.bf16.msra.mxu3 %v571_v29 }
 0x119   : > { %v594_v30 = vpop.permute.xlu1 %593 }
 0x11a   : > { %v599_v31 = vsel %vm527_vm1, %v594_v30, 0 }
 0x11b   : > { %608 = vmatpush.bf16.xpose.msrb.mxu3 %v599_v31 }
 0x121   : > { %v772_v55 = vpop.permute.xlu1 %771 }
 0x126   : > { %v543_v32 = vpop.f32.mrf.mxu2 }
 0x127   : > { %v547_v34 = vmul.f32 0.35355338, %v543_v32 }
 0x129   : > { %v548_v35 = vadd.f32 %v547_v34, %v449_v33 }
 0x12b   : > { %v549_v36 = vsel %vm527_vm1, %v548_v35, -inf }
 0x12c   : > { %550 = vmax.xlane.f32.xlu0 %v549_v36  ;;  %v1032_v36 = vld [vmem:[%s1401_s7 + $0x4] sm:$0xf] }
 0x12e   : > { %v545_v37 = vpop.f32.mrf.mxu2 }
 0x12f   : > { %v656_v37 = vsel %vm569_vm2, %v1032_v36, 0 }
 0x130   : > { %665 = vmatpush.bf16.msrb.mxu1 %v656_v37 }
 0x19f   : > { %v551_v38 = vpop.xlane.xlu0 %550 }
 0x1a0   : > { %v552_v39 = vsub.f32 %v548_v35, %v551_v38  ;;  %v1037_v38 = vld [vmem:[%s1401_s7 + $0x8] sm:$0xf] }
 0x1a2   : > { %v553_v40 = vmul.f32 1.442695, %v552_v39 }
 0x1a4   : > { %1091 = vpow2.f32 %v553_v40  ;;  %v755_v40 = vsel %vm569_vm2, %v1037_v38, 0 }
 0x1a5   : > { %764 = vmatpush.bf16.msra.mxu1 %v755_v40 }
 0x1aa   : > { %v1092_v41 = vpop.eup %1091 }
 0x1ab   : > { %v555_v42 = vsel %vm527_vm1, %v1092_v41, 0.0 }
 0x1ac   : > { %556 = vadd.xlane.f32.xlu0 %v555_v42 }
 0x1c0   : > { %692 = vrot.lane.b32.xlu0 %v1319_v20, %s1192_s16 }
 0x21f   : > { %v557_v43 = vpop.xlane.xlu0 %556 }
 0x220   : > { %1093 = vrcp.f32 %v557_v43 }
 0x226   : > { %v1094_v44 = vpop.eup %1093 }
 0x227   : > { %v559_v45 = vmul.f32 %v1094_v44, %v1092_v41 }
 0x229   : > { %v560_v46 = vpack.c.bf16 %v559_v45, %v559_v45 }
 0x22b   : > { %1029 = vmatmul.msk.bf16.vlgmr.msra.gmra.mxu3 %vm527_vm1, %v560_v46 }
 0x232   : > { %v693_v47 = vpop.permute.xlu0 %692 }
 0x233   : > { %v698_v48 = vsel %vm527_vm1, %v693_v47, 0 }
 0x234   : > { %707 = vmatpush.bf16.xpose.msra.mxu3 %v698_v48 }
 0x23b   : > { %1030 = vmatmul.msk.bf16.vlgmr.msrb.gmra.mxu3 %vm527_vm1, %v592_v25 }
 0x24b   : > { %1035 = vmatmul.msk.bf16.vlgmr.msra.gmra.mxu3 %vm527_vm1, %v691_v49 }
 0x2ae   : > { %v582_v50 = vpop.f32.mrf.mxu3 }
 0x2af   : > { %v586_v51 = vpack.c.bf16 %v582_v50, %v582_v50 }
 0x2b1   : > { %1034 = vmatmul.msk.bf16.vlgmr.msrb.gmra.mxu2 %vm527_vm1, %v586_v51  ;;  %v1041_v51 = vld [vmem:[%s1401_s7 + $0xc] sm:$0xf] }
 0x2b6   : > { %v584_v52 = vpop.f32.mrf.mxu3 }
 0x2b7   : > { %v836_v52 = vsel %vm569_vm2, %v1041_v51, 0 }
 0x2be   : > { %v610_v53 = vpop.f32.mrf.mxu3 }
 0x2bf   : > { %v614_v54 = vmul.f32 0.35355338, %v610_v53 }
 0x2c1   : > { %1039 = vmatmul.msk.bf16.vlgmr.msra.gmra.mxu2 %vm527_vm1, %v772_v55  ;;  %v615_v56 = vadd.f32 %v614_v54, %v449_v33 }
 0x2c3   : > { %v616_v57 = vsel %vm527_vm1, %v615_v56, -inf }
 0x2c4   : > { %617 = vmax.xlane.f32.xlu1 %v616_v57 }
 0x2c6   : > { %v612_v58 = vpop.f32.mrf.mxu3 }
 0x2ce   : > { %v709_v59 = vpop.f32.mrf.mxu3 }
 0x2cf   : > { %v713_v60 = vmul.f32 0.35355338, %v709_v59 }
 0x2d1   : > { %v714_v61 = vadd.f32 %v713_v60, %v449_v33 }
 0x2d3   : > { %v715_v62 = vsel %vm527_vm1, %v714_v61, -inf }
 0x2d4   : > { %716 = vmax.xlane.f32.xlu0 %v715_v62  ;;  %v1088_v62 = vld [vmem:[%s1402_s8] ss:$0 sm:$0xff] }
 0x2d6   : > { %v711_v63 = vpop.f32.mrf.mxu3 }
 0x2dd   : > { %628 = vrot.lane.b32.xlu1 %v1319_v20, %s1193_s21 }
 0x334   : > { %v1350_v0 = vpop.f32.mrf.mxu2 }
 0x337   : > { %v618_v2 = vpop.xlane.xlu1 %617 }
 0x338   : > { %v619_v3 = vsub.f32 %v615_v56, %v618_v2 }
 0x33a   : > { %v620_v5 = vmul.f32 1.442695, %v619_v3 }
 0x33c   : > { %v688_v1 = vpop.f32.mrf.mxu2  ;;  %1095 = vpow2.f32 %v620_v5 }
 0x342   : > { %v1096_v14 = vpop.eup %1095 }
 0x343   : > { %v622_v17 = vsel %vm527_vm1, %v1096_v14, 0.0 }
 0x344   : > { %v790_v6 = vpop.f32.mrf.mxu2 }
 0x345   : > { %v794_v7 = vmul.f32 0.35355338, %v790_v6 }
 0x347   : > { %v717_v8 = vpop.xlane.xlu0 %716  ;;  %v795_v9 = vadd.f32 %v794_v7, %v449_v33  ;;  %v1196_v7 = vmov 32.0  }
 0x348   : > { %v718_v10 = vsub.f32 %v714_v61, %v717_v8 }
 0x349   : > { %v796_v11 = vsel %vm527_vm1, %v795_v9, -inf }
 0x34a   : > { %v719_v12 = vmul.f32 1.442695, %v718_v10  ;;  %797 = vmax.xlane.f32.xlu2 %v796_v11 }
 0x34c   : > { %1097 = vpow2.f32 %v719_v12  ;;  %v792_v13 = vpop.f32.mrf.mxu2 }
 0x34f   : > { %v629_v15 = vpop.permute.xlu1 %628 }
 0x350   : > { %v634_v16 = vsel %vm569_vm2, %v629_v15, 0 }
 0x351   : > { %643 = vmatpush.bf16.msrb.mxu0 %v634_v16 }
 0x352   : > { %v1098_v18 = vpop.eup %1097  ;;  %623 = vadd.xlane.f32.xlu2 %v622_v17 }
 0x353   : > { %v721_v19 = vsel %vm527_vm1, %v1098_v18, 0.0 }
 0x354   : > { %722 = vadd.xlane.f32.xlu0 %v721_v19 }
 0x368   : > { %727 = vrot.lane.b32.xlu0 %v1319_v20, %s1194_s24 }
 0x3bd   : > { %v798_v21 = vpop.xlane.xlu2 %797 }
 0x3be   : > { %v799_v22 = vsub.f32 %v795_v9, %v798_v21 }
 0x3c0   : > { %v800_v23 = vmul.f32 1.442695, %v799_v22 }
 0x3c2   : > { %1099 = vpow2.f32 %v800_v23 }
 0x3c5   : > { %v624_v24 = vpop.xlane.xlu2 %623 }
 0x3c6   : > { %1101 = vrcp.f32 %v624_v24 }
 0x3c7   : > { %v723_v29 = vpop.xlane.xlu0 %722 }
 0x3c8   : > { %v1100_v25 = vpop.eup %1099  ;;  %1103 = vrcp.f32 %v723_v29  ;;  %v1090_v29 = vld [vmem:[#allocation4] ss:$0 sm:$0xff] }
 0x3c9   : > { %v802_v26 = vsel %vm527_vm1, %v1100_v25, 0.0 }
 0x3ca   : > { %803 = vadd.xlane.f32.xlu2 %v802_v26 }
 0x3cc   : > { %v1102_v27 = vpop.eup %1101 }
 0x3cd   : > { %v626_v28 = vmul.f32 %v1102_v27, %v1096_v14  ;;  %v1089_v27 = vld [vmem:[#allocation2] ss:$0 sm:$0xff] }
 0x3ce   : > { %v1104_v31 = vpop.eup %1103 }
 0x3cf   : > { %v627_v30 = vpack.c.bf16 %v626_v28, %v626_v28  ;;  %v725_v33 = vmul.f32 %v1104_v31, %v1098_v18 }
 0x3d1   : > { %1031 = vmatmul.msk.bf16.vlgmr.msrb.gmra.mxu0 %vm527_vm1, %v627_v30  ;;  %v726_v35 = vpack.c.bf16 %v725_v33, %v725_v33 }
 0x3da   : > { %v728_v32 = vpop.permute.xlu0 %727 }
 0x3db   : > { %v733_v34 = vsel %vm569_vm2, %v728_v32, 0 }
 0x3dc   : > { %742 = vmatpush.bf16.msra.mxu0 %v733_v34 }
 0x3e0   : > { %845 = vmatpush.bf16.msrb.mxu0 %v836_v52 }
 0x3e1   : > { %1036 = vmatmul.msk.bf16.vlgmr.msra.gmra.mxu0 %vm527_vm1, %v726_v35 }
 0x3e2   : > { %808 = vrot.lane.b32.xlu2 %v1319_v20, %s1195_s25 }
 0x43d   : > { %v804_v39 = vpop.xlane.xlu2 %803 }
 0x43e   : > { %1105 = vrcp.f32 %v804_v39 }
 0x43f   : > { %1107 = vrcp.f32 %v1196_v7 }
 0x444   : > { %v1106_v41 = vpop.eup %1105 }
 0x445   : > { %v806_v42 = vmul.f32 %v1106_v41, %v1100_v25  ;;  %v809_v43 = vpop.permute.xlu2 %808  ;;  %v1108_v8 = vpop.eup %1107 }
 0x446   : > { %v814_v20 = vsel %vm569_vm2, %v809_v43, 0  ;;  %vm866_vm3 = vweird.f32 %v1108_v8 }
 0x447   : > { %v807_v44 = vpack.c.bf16 %v806_v42, %v806_v42  ;;  %823 = vmatpush.bf16.msrb.mxu3 %v814_v20 }
 0x44a   : > { %1040 = vmatmul.msk.bf16.vlgmr.msrb.gmra.mxu3 %vm527_vm1, %v807_v44 }
 0x44e   : > { %v645_v45 = vpop.f32.mrf.mxu0 }
 0x44f   : > { %v649_v46 = vpack.c.bf16 %v645_v45, %v645_v45 }
 0x451   : > { %1033 = vmatmul.msk.bf16.vlgmr.msrb.gmra.mxu1 %vm527_vm1, %v649_v46 }
 0x456   : > { %v647_v47 = vpop.f32.mrf.mxu0 }
 0x45e   : > { %v744_v48 = vpop.f32.mrf.mxu0 }
 0x45f   : > { %v748_v49 = vpack.c.bf16 %v744_v48, %v744_v48 }
 0x461   : > { %1038 = vmatmul.msk.bf16.vlgmr.msra.gmra.mxu1 %vm527_vm1, %v748_v49 }
 0x466   : > { %v746_v50 = vpop.f32.mrf.mxu0 }
 0x4cd   : > { %v825_v53 = vpop.f32.mrf.mxu3 }
 0x4ce   : > { %v829_v54 = vpack.c.bf16 %v825_v53, %v825_v53  ;;  %v667_v55 = vpop.f32.mrf.mxu1 }
 0x4cf   : > { %v687_v58 = vadd.f32 %v1350_v0, %v667_v55  ;;  %v862_v0 = vmul.f32 32.0, %v1108_v8 }
 0x4d0   : > { %1042 = vmatmul.msk.bf16.vlgmr.msrb.gmra.mxu0 %vm527_vm1, %v829_v54 }
 0x4d1   : > { %v863_v9 = vsub.f32 1.0, %v862_v0 }
 0x4d3   : > { %v864_v10 = vmul.f32 %v1108_v8, %v863_v9 }
 0x4d5   : > { %v827_v56 = vpop.f32.mrf.mxu3  ;;  %v865_v11 = vadd.f32 %v1108_v8, %v864_v10 }
 0x4d6   : > { %v669_v57 = vpop.f32.mrf.mxu1 }
 0x4d7   : > { %v867_v12 = vsel %vm866_vm3, %v1108_v8, %v865_v11 }
 0x4de   : > { %v766_v59 = vpop.f32.mrf.mxu1 }
 0x4df   : > { %v770_v60 = vadd.f32 %v766_v59, %v687_v58 }
 0x4e6   : > { %v768_v61 = vpop.f32.mrf.mxu1 }
 0x54d   : > { %v847_v63 = vpop.f32.mrf.mxu0 }
 0x54e   : > { %v851_v1 = vadd.f32 %v847_v63, %v770_v60 }
 0x550   : > { %v856_v2 = vadd.f32 %v1088_v62, %v851_v1 }
 0x552   : > { %v857_v3 = vadd.f32 %v856_v2, %v1306_v4 }
 0x554   : > { %v858_v5 = vsel %vm471_vm0, %v857_v3, 0.0 }
 0x555   : > { %859 = vadd.xlane.f32.xlu1 %v858_v5  ;;  %v849_v6 = vpop.f32.mrf.mxu0 }
 0x5c8   : > { %v860_v13 = vpop.xlane.xlu1 %859 }
 0x5c9   : > { %v868_v14 = vmul.f32 %v867_v12, %v860_v13 }
 0x5cb   : > { %v869_v15 = vsub.f32 %v857_v3, %v868_v14 }
 0x5cd   : > { %v870_v16 = vmul.f32 %v869_v15, %v869_v15 }
 0x5cf   : > { %v871_v17 = vsel %vm471_vm0, %v870_v16, 0.0 }
 0x5d0   : > { %872 = vadd.xlane.f32.xlu2 %v871_v17 }
 0x643   : > { %v873_v4 = vpop.xlane.xlu2 %872 }
 0x644   : > { %v874_v18 = vmul.f32 %v873_v4, %v867_v12 }
 0x646   : > { %v875_v19 = vadd.f32 1e-05, %v874_v18 }
 0x648   : > { %1109 = vrsqrt.f32 %v875_v19  ;;  %vm882_vm5 = vweird.f32 %v875_v19 }
 0x64e   : > { %v1110_v21 = vpop.eup %1109 }
 0x64f   : > { %v877_v22 = vmul.f32 %v1110_v21, %v875_v19  ;;  %vm883_vm4 = vweird.f32 %v1110_v21 }
 0x650   : > { %vm884_vm6 = vmor %vm882_vm5, %vm883_vm4 }
 0x651   : > { %v878_v23 = vmul.f32 %v1110_v21, %v877_v22 }
 0x653   : > { %v879_v24 = vmul.f32 0.5, %v878_v23 }
 0x655   : > { %v880_v25 = vsub.f32 1.5, %v879_v24 }
 0x657   : > { %v881_v26 = vmul.f32 %v1110_v21, %v880_v25 }
 0x659   : > { %v885_v28 = vsel %vm884_vm6, %v1110_v21, %v881_v26 }
 0x65a   : > { %v886_v30 = vmul.f32 %v885_v28, %v869_v15 }
 0x65c   : > { %v891_v31 = vmul.f32 %v1089_v27, %v886_v30 }
 0x65e   : > { %v896_v32 = vadd.f32 %v1090_v29, %v891_v31 }
 0x660   : > { %897 = vst.msk [vmem:[%s445_s19] sm:$0xff] %vm471_vm0, %v896_v32 }
 0x661 PF: > { %s23_s17 = sadd.s32 1, %s1185_s17  }
 0x662   : > { %p20_p7 = scmp.ge.s32.totalorder %s23_s17, 4  }
 0x664   :  { %22 = sbr.rel (!%p20_p7) target bundleno = 2 (0x2), region = 112 }
 0x669   :  { %917 = vsyncpa [#allocation3], 1 }
 0x66a   :  { %919 = vsyncpa [#allocation3 + $0x1], 1 }
 0x66b   :  { %920 = vsyncpa [#allocation5], 1 }

</bundles_post_ra>
